<compile_context>
chip_gen: v7x
topology: tpu7x:2x2x1
jax: 0.10.0
libtpu: 0.0.40
codegen_flags: <defaults>
</compile_context>

<pallas_src>
import jax
import jax.numpy as jnp
from jax.experimental import pallas as pl
from jax.experimental.pallas import tpu as pltpu

TILE_R = 128       # node-row tile (output rows per step)
TILE_K = 512       # aggregation column tile of M (K grid axis)
TILE_E = 512       # edges per step (lane width of score output)
EDGE_CHUNK = 512   # node chunk inside edge scoring (divides N_pad)

_VMEM_LIMIT = 32 * 1024 * 1024   # leaves headroom on v7x's 64 MiB VMEM


def _round_up(x, m):
    return (x + m - 1) // m * m


# ---------------------------------------------------------------------------
# Kernel 1: GraphConv layer 1 for one row tile (K-tiled aggregation), plus the
# row-wise parts of the reassociated layer 2:
#   z = h1 @ Wr2  (bf16, aggregated by kernel 2)
#   r = h1 @ Wo2 + b2  (f32, the "root" term of layer 2)
# ---------------------------------------------------------------------------
def _conv1_kernel(m_ref, xb_ref, x_tile_ref,
                  wr1_ref, wo1_ref, b1_ref,
                  wr2_ref, wo2_ref, b2_ref,
                  z_ref, r_ref, acc_ref):
    k = pl.program_id(1)

    @pl.when(k == 0)
    def _():
        acc_ref[...] = jnp.zeros_like(acc_ref)

    # mean-aggregation partial sum: acc += M[i, k] @ x[k]   (bf16 MXU, f32 acc)
    acc_ref[...] += jnp.dot(m_ref[...], xb_ref[...],
                            preferred_element_type=jnp.float32)

    @pl.when(k == pl.num_programs(1) - 1)
    def _():
        h1 = (jnp.dot(acc_ref[...], wr1_ref[...],
                      preferred_element_type=jnp.float32)
              + jnp.dot(x_tile_ref[...], wo1_ref[...],
                        preferred_element_type=jnp.float32)
              + b1_ref[...])
        h1 = jax.nn.sigmoid(h1)
        z_ref[...] = jnp.dot(h1, wr2_ref[...],
                             preferred_element_type=jnp.float32).astype(z_ref.dtype)
        r_ref[...] = (jnp.dot(h1, wo2_ref[...],
                              preferred_element_type=jnp.float32)
                      + b2_ref[...])


# ---------------------------------------------------------------------------
# Kernel 2: layer-2 aggregation for one row tile (K-tiled):
#   h2 = M_tile @ z + r_tile, stored transposed (lane-dense) in bf16.
# ---------------------------------------------------------------------------
def _conv2_kernel(m_ref, z_ref, r_ref, h2t_ref, acc_ref):
    k = pl.program_id(1)

    @pl.when(k == 0)
    def _():
        acc_ref[...] = jnp.zeros_like(acc_ref)

    acc_ref[...] += jnp.dot(m_ref[...], z_ref[...],
                            preferred_element_type=jnp.float32)

    @pl.when(k == pl.num_programs(1) - 1)
    def _():
        h2 = acc_ref[...] + r_ref[...]                      # (TILE_R, out_f) f32
        h2t_ref[...] = jnp.transpose(h2).astype(h2t_ref.dtype)  # (out_f, TILE_R)


# ---------------------------------------------------------------------------
# Kernel 3: dot-product predictor for one edge tile, chunked over nodes.
#   h2t chunk: (out_f, EDGE_CHUNK) bf16
#   src/dst:   (1, TILE_E) int32
#   score[e] = sum_f h2[src_e, f] * h2[dst_e, f]
# Gathers are an in-kernel one-hot (bf16, exact 0/1) fused into a single MXU
# dot against concat([sel_src, sel_dst]); the accumulator persists across the
# node-chunk ("arbitrary") grid axis.
# ---------------------------------------------------------------------------
def _edge_score_kernel(h2t_ref, src_ref, dst_ref, out_ref, acc_ref):
    c = pl.program_id(1)

    @pl.when(c == 0)
    def _():
        acc_ref[...] = jnp.zeros_like(acc_ref)

    chunk = h2t_ref.shape[1]
    te = src_ref.shape[1]
    base = c * chunk
    ids = jnp.concatenate([src_ref[...], dst_ref[...]], axis=1)       # (1, 2*TE)
    row = jax.lax.broadcasted_iota(jnp.int32, (chunk, 2 * te), 0) + base
    sel = (row == ids).astype(jnp.bfloat16)                           # exact 0/1
    acc_ref[...] += jnp.dot(h2t_ref[...], sel,
                            preferred_element_type=jnp.float32)       # (out_f, 2*TE)

    @pl.when(c == pl.num_programs(1) - 1)
    def _():
        hs = acc_ref[:, :te]
        hd = acc_ref[:, te:]
        out_ref[...] = jnp.sum(hs * hd, axis=0, keepdims=True)


# ---------------------------------------------------------------------------
# Wrapper
# ---------------------------------------------------------------------------
def sage_dot_predict(x, edge_index, edge_attr, params):
    Wr1, Wo1, b1, Wr2, Wo2, b2 = params
    N, in_f = x.shape
    hid = Wr1.shape[1]
    out_f = Wr2.shape[1]
    src = edge_index[0].astype(jnp.int32)
    dst = edge_index[1].astype(jnp.int32)
    E = src.shape[0]
    w = edge_attr.reshape(-1).astype(jnp.float32)

    # N_pad multiple of TILE_K (=> also of TILE_R and EDGE_CHUNK).
    N_pad = _round_up(max(N, 1), TILE_K)
    E_pad = _round_up(max(E, 1), TILE_E)

    # Dense mean-normalized weighted adjacency, built directly at padded size
    # (one scatter; 1/deg scale and bf16 cast fused).  Count-based mean matches
    # PyG GraphConv(aggr='mean') with edge weights.
    deg = jnp.zeros((N_pad,), jnp.float32).at[dst].add(1.0)
    inv_deg = jnp.where(deg > 0, 1.0 / jnp.maximum(deg, 1.0), 0.0)
    M = (jnp.zeros((N_pad, N_pad), jnp.float32).at[dst, src].add(w)
         * inv_deg[:, None]).astype(jnp.bfloat16)

    x_f32 = jnp.pad(x.astype(jnp.float32), ((0, N_pad - N), (0, 0)))
    x_bf16 = x_f32.astype(jnp.bfloat16)            # pre-cast once for M @ x
    src_p = jnp.pad(src, (0, E_pad - E)).reshape(1, E_pad)
    dst_p = jnp.pad(dst, (0, E_pad - E)).reshape(1, E_pad)

    n_row = N_pad // TILE_R
    n_k = N_pad // TILE_K
    e_tiles = E_pad // TILE_E
    n_chunks = N_pad // EDGE_CHUNK

    node_cp = pltpu.CompilerParams(
        dimension_semantics=("parallel", "arbitrary"),
        vmem_limit_bytes=_VMEM_LIMIT)
    edge_cp = pltpu.CompilerParams(
        dimension_semantics=("parallel", "arbitrary"),
        vmem_limit_bytes=_VMEM_LIMIT)

    # ---- layer 1 (+ row-wise layer-2 projections), grid (rows, K) ----------
    z, r = pl.pallas_call(
        _conv1_kernel,
        grid=(n_row, n_k),
        in_specs=[
            pl.BlockSpec((TILE_R, TILE_K), lambda i, k: (i, k)),   # M tile
            pl.BlockSpec((TILE_K, in_f), lambda i, k: (k, 0)),     # x (bf16, agg)
            pl.BlockSpec((TILE_R, in_f), lambda i, k: (i, 0)),     # x row (f32 root)
            pl.BlockSpec((in_f, hid), lambda i, k: (0, 0)),        # Wr1
            pl.BlockSpec((in_f, hid), lambda i, k: (0, 0)),        # Wo1
            pl.BlockSpec((1, hid), lambda i, k: (0, 0)),           # b1
            pl.BlockSpec((hid, out_f), lambda i, k: (0, 0)),       # Wr2
            pl.BlockSpec((hid, out_f), lambda i, k: (0, 0)),       # Wo2
            pl.BlockSpec((1, out_f), lambda i, k: (0, 0)),         # b2
        ],
        out_specs=[
            pl.BlockSpec((TILE_R, out_f), lambda i, k: (i, 0)),    # z = h1 @ Wr2
            pl.BlockSpec((TILE_R, out_f), lambda i, k: (i, 0)),    # r = h1 @ Wo2+b2
        ],
        out_shape=[
            jax.ShapeDtypeStruct((N_pad, out_f), jnp.bfloat16),
            jax.ShapeDtypeStruct((N_pad, out_f), jnp.float32),
        ],
        scratch_shapes=[pltpu.VMEM((TILE_R, in_f), jnp.float32)],
        compiler_params=node_cp,
    )(M, x_bf16, x_f32, Wr1, Wo1, b1, Wr2, Wo2, b2)

    # ---- layer 2 aggregation, grid (rows, K); output already transposed ----
    h2t = pl.pallas_call(
        _conv2_kernel,
        grid=(n_row, n_k),
        in_specs=[
            pl.BlockSpec((TILE_R, TILE_K), lambda i, k: (i, k)),   # M tile
            pl.BlockSpec((TILE_K, out_f), lambda i, k: (k, 0)),    # z (bf16)
            pl.BlockSpec((TILE_R, out_f), lambda i, k: (i, 0)),    # r row tile
        ],
        out_specs=pl.BlockSpec((out_f, TILE_R), lambda i, k: (0, i)),
        out_shape=jax.ShapeDtypeStruct((out_f, N_pad), jnp.bfloat16),
        scratch_shapes=[pltpu.VMEM((TILE_R, out_f), jnp.float32)],
        compiler_params=node_cp,
    )(M, z, r)

    # ---- edge scores, grid (edge tiles, node chunks); lane-dense output ----
    scores = pl.pallas_call(
        _edge_score_kernel,
        grid=(e_tiles, n_chunks),
        in_specs=[
            pl.BlockSpec((out_f, EDGE_CHUNK), lambda e, c: (0, c)),  # h2^T chunk
            pl.BlockSpec((1, TILE_E), lambda e, c: (0, e)),          # src ids
            pl.BlockSpec((1, TILE_E), lambda e, c: (0, e)),          # dst ids
        ],
        out_specs=pl.BlockSpec((1, TILE_E), lambda e, c: (0, e)),
        out_shape=jax.ShapeDtypeStruct((1, E_pad), jnp.float32),
        scratch_shapes=[pltpu.VMEM((out_f, 2 * TILE_E), jnp.float32)],
        compiler_params=edge_cp,
    )(h2t, src_p, dst_p)

    return scores[0, :E]


# ---------------------------------------------------------------------------
# Pure-JAX f32 reference mirroring the PyTorch module semantics
# ---------------------------------------------------------------------------
def ref_forward(x, edge_index, edge_attr, params):
    src, dst = edge_index[0], edge_index[1]
    w = edge_attr.reshape(-1)
    N = x.shape[0]

    def conv(h, Wr, Wo, b):
        msg = w[:, None] * h[src]
        agg = jnp.zeros((N, h.shape[1]), jnp.float32).at[dst].add(msg)
        cnt = jnp.zeros((N,), jnp.float32).at[dst].add(1.0)
        agg = agg / jnp.maximum(cnt, 1.0)[:, None]
        return agg @ Wr + b + h @ Wo

    Wr1, Wo1, b1, Wr2, Wo2, b2 = params
    h = jax.nn.sigmoid(conv(x, Wr1, Wo1, b1))
    h = conv(h, Wr2, Wo2, b2)
    return jnp.sum(h[src] * h[dst], axis=-1)


if __name__ == "__main__":
    key = jax.random.PRNGKey(0)
    N, E = 16, 24               # nodes, edges
    in_f, hid_f, out_f = 8, 16, 8

    ks = jax.random.split(key, 10)
    x = jax.random.normal(ks[0], (N, in_f), jnp.float32)
    src = jax.random.randint(ks[1], (E,), 0, N)
    dst = jax.random.randint(ks[2], (E,), 0, N)
    edge_index = jnp.stack([src, dst], axis=0)
    edge_attr = jax.random.uniform(ks[3], (E,), jnp.float32, 0.1, 1.0)

    # GraphConv = lin_rel (with bias) + lin_root; weights stored (in, out).
    s1 = 1.0 / jnp.sqrt(in_f)
    s2 = 1.0 / jnp.sqrt(hid_f)
    Wr1 = jax.random.uniform(ks[4], (in_f, hid_f), jnp.float32, -s1, s1)
    Wo1 = jax.random.uniform(ks[5], (in_f, hid_f), jnp.float32, -s1, s1)
    b1 = jax.random.uniform(ks[6], (1, hid_f), jnp.float32, -s1, s1)
    Wr2 = jax.random.uniform(ks[7], (hid_f, out_f), jnp.float32, -s2, s2)
    Wo2 = jax.random.uniform(ks[8], (hid_f, out_f), jnp.float32, -s2, s2)
    b2 = jax.random.uniform(ks[9], (1, out_f), jnp.float32, -s2, s2)

    params = (Wr1, Wo1, b1, Wr2, Wo2, b2)

    score = sage_dot_predict(x, edge_index, edge_attr, params)
    score = jax.block_until_ready(score)

    ref = ref_forward(x, edge_index, edge_attr, params)
    assert score.shape == (E,)
    # bf16 adjacency / aggregated operands / h2 -> looser tolerance vs f32 ref
    assert jnp.allclose(score, ref, atol=5e-2, rtol=5e-2), (score, ref)
    print("KERNEL_OK")
</pallas_src>

<mosaic_0001>
module attributes {stable_mosaic.version = 11 : i64} {
  func.func @_conv1_kernel(%arg0: i32, %arg1: i32, %arg2: memref<128x512xbf16, #tpu.memory_space<vmem>>, %arg3: memref<512x8xbf16, #tpu.memory_space<vmem>>, %arg4: memref<128x8xf32, #tpu.memory_space<vmem>>, %arg5: memref<8x16xf32, #tpu.memory_space<vmem>>, %arg6: memref<8x16xf32, #tpu.memory_space<vmem>>, %arg7: memref<1x16xf32, #tpu.memory_space<vmem>>, %arg8: memref<16x8xf32, #tpu.memory_space<vmem>>, %arg9: memref<16x8xf32, #tpu.memory_space<vmem>>, %arg10: memref<1x8xf32, #tpu.memory_space<vmem>>, %arg11: memref<128x8xbf16, #tpu.memory_space<vmem>>, %arg12: memref<128x8xf32, #tpu.memory_space<vmem>>, %arg13: memref<128x8xf32, #tpu.memory_space<vmem>>) attributes {dimension_semantics = [#tpu.dimension_semantics<parallel>, #tpu.dimension_semantics<arbitrary>], iteration_bounds = array<i64: 4, 1>, scalar_prefetch = 0 : i64, scratch_operands = 1 : i64, tpu.core_type = #tpu.core_type<tc>, window_params = [{transform_indices = @transform_0, window_bounds = array<i64: 128, 512>}, {transform_indices = @transform_1, window_bounds = array<i64: 512, 8>}, {transform_indices = @transform_2, window_bounds = array<i64: 128, 8>}, {pipeline_mode = #tpu.pipeline_mode<synchronous>, transform_indices = @transform_3, window_bounds = array<i64: 8, 16>}, {pipeline_mode = #tpu.pipeline_mode<synchronous>, transform_indices = @transform_4, window_bounds = array<i64: 8, 16>}, {pipeline_mode = #tpu.pipeline_mode<synchronous>, transform_indices = @transform_5, window_bounds = array<i64: 1, 16>}, {pipeline_mode = #tpu.pipeline_mode<synchronous>, transform_indices = @transform_6, window_bounds = array<i64: 16, 8>}, {pipeline_mode = #tpu.pipeline_mode<synchronous>, transform_indices = @transform_7, window_bounds = array<i64: 16, 8>}, {pipeline_mode = #tpu.pipeline_mode<synchronous>, transform_indices = @transform_8, window_bounds = array<i64: 1, 8>}, {transform_indices = @transform_9, window_bounds = array<i64: 128, 8>}, {transform_indices = @transform_10, window_bounds = array<i64: 128, 8>}]} {
    %c0_i32 = arith.constant 0 : i32
    %0 = arith.cmpi eq, %arg1, %c0_i32 : i32
    %1 = arith.extui %0 : i1 to i32
    %c0_i32_0 = arith.constant 0 : i32
    %2 = arith.cmpi ne, %1, %c0_i32_0 : i32
    scf.if %2 {
      %cst_10 = arith.constant 0.000000e+00 : f32
      %12 = vector.broadcast %cst_10 : f32 to vector<128x8xf32>
      %c0_11 = arith.constant 0 : index
      %c0_12 = arith.constant 0 : index
      %13 = vector.load %arg13[%c0_11, %c0_12] : memref<128x8xf32, #tpu.memory_space<vmem>>, vector<128x8xf32>
      tpu.vector_store %arg13[%c0_11, %c0_12], %12 {strides = array<i32>} : memref<128x8xf32, #tpu.memory_space<vmem>>, vector<128x8xf32>,
    } else {
    }
    %c0 = arith.constant 0 : index
    %c0_1 = arith.constant 0 : index
    %3 = vector.load %arg13[%c0, %c0_1] : memref<128x8xf32, #tpu.memory_space<vmem>>, vector<128x8xf32>
    %c0_2 = arith.constant 0 : index
    %c0_3 = arith.constant 0 : index
    %4 = vector.load %arg2[%c0_2, %c0_3] : memref<128x512xbf16, #tpu.memory_space<vmem>>, vector<128x512xbf16>
    %c0_4 = arith.constant 0 : index
    %c0_5 = arith.constant 0 : index
    %5 = vector.load %arg3[%c0_4, %c0_5] : memref<512x8xbf16, #tpu.memory_space<vmem>>, vector<512x8xbf16>
    %cst = arith.constant dense<0.000000e+00> : vector<128x8xf32>
    %6 = tpu.matmul %4, %5, %cst {dimension_numbers = #tpu.dot_dimension_numbers<[1], [0], [0], [1], [0, 0, 1, 1], [], []>} : vector<128x512xbf16>, vector<512x8xbf16>, vector<128x8xf32> -> vector<128x8xf32>
    %7 = arith.addf %3, %6 : vector<128x8xf32>
    %c0_6 = arith.constant 0 : index
    %c0_7 = arith.constant 0 : index
    %8 = vector.load %arg13[%c0_6, %c0_7] : memref<128x8xf32, #tpu.memory_space<vmem>>, vector<128x8xf32>
    tpu.vector_store %arg13[%c0_6, %c0_7], %7 {strides = array<i32>} : memref<128x8xf32, #tpu.memory_space<vmem>>, vector<128x8xf32>,
    %c0_i32_8 = arith.constant 0 : i32
    %9 = arith.cmpi eq, %arg1, %c0_i32_8 : i32
    %10 = arith.extui %9 : i1 to i32
    %c0_i32_9 = arith.constant 0 : i32
    %11 = arith.cmpi ne, %10, %c0_i32_9 : i32
    scf.if %11 {
      %c0_10 = arith.constant 0 : index
      %c0_11 = arith.constant 0 : index
      %12 = vector.load %arg13[%c0_10, %c0_11] : memref<128x8xf32, #tpu.memory_space<vmem>>, vector<128x8xf32>
      %c0_12 = arith.constant 0 : index
      %c0_13 = arith.constant 0 : index
      %13 = vector.load %arg5[%c0_12, %c0_13] : memref<8x16xf32, #tpu.memory_space<vmem>>, vector<8x16xf32>
      %cst_14 = arith.constant dense<0.000000e+00> : vector<128x16xf32>
      %14 = tpu.matmul %12, %13, %cst_14 {dimension_numbers = #tpu.dot_dimension_numbers<[1], [0], [0], [1], [0, 0, 1, 1], [], []>} : vector<128x8xf32>, vector<8x16xf32>, vector<128x16xf32> -> vector<128x16xf32>
      %c0_15 = arith.constant 0 : index
      %c0_16 = arith.constant 0 : index
      %15 = vector.load %arg4[%c0_15, %c0_16] : memref<128x8xf32, #tpu.memory_space<vmem>>, vector<128x8xf32>
      %c0_17 = arith.constant 0 : index
      %c0_18 = arith.constant 0 : index
      %16 = vector.load %arg6[%c0_17, %c0_18] : memref<8x16xf32, #tpu.memory_space<vmem>>, vector<8x16xf32>
      %cst_19 = arith.constant dense<0.000000e+00> : vector<128x16xf32>
      %17 = tpu.matmul %15, %16, %cst_19 {dimension_numbers = #tpu.dot_dimension_numbers<[1], [0], [0], [1], [0, 0, 1, 1], [], []>} : vector<128x8xf32>, vector<8x16xf32>, vector<128x16xf32> -> vector<128x16xf32>
      %18 = arith.addf %14, %17 : vector<128x16xf32>
      %c0_20 = arith.constant 0 : index
      %c0_21 = arith.constant 0 : index
      %19 = vector.load %arg7[%c0_20, %c0_21] : memref<1x16xf32, #tpu.memory_space<vmem>>, vector<1x16xf32>
      %20 = vector.broadcast %19 : vector<1x16xf32> to vector<128x16xf32>
      %21 = arith.addf %18, %20 : vector<128x16xf32>
      %22 = arith.negf %21 : vector<128x16xf32>
      %23 = math.exp %22 : vector<128x16xf32>
      %cst_22 = arith.constant 1.000000e+00 : f32
      %24 = vector.broadcast %cst_22 : f32 to vector<128x16xf32>
      %25 = arith.addf %24, %23 : vector<128x16xf32>
      %26 = arith.divf %24, %25 : vector<128x16xf32>
      %c0_23 = arith.constant 0 : index
      %c0_24 = arith.constant 0 : index
      %27 = vector.load %arg8[%c0_23, %c0_24] : memref<16x8xf32, #tpu.memory_space<vmem>>, vector<16x8xf32>
      %cst_25 = arith.constant dense<0.000000e+00> : vector<128x8xf32>
      %28 = tpu.matmul %26, %27, %cst_25 {dimension_numbers = #tpu.dot_dimension_numbers<[1], [0], [0], [1], [0, 0, 1, 1], [], []>} : vector<128x16xf32>, vector<16x8xf32>, vector<128x8xf32> -> vector<128x8xf32>
      %29 = arith.truncf %28 : vector<128x8xf32> to vector<128x8xbf16>
      %c0_26 = arith.constant 0 : index
      %c0_27 = arith.constant 0 : index
      %30 = vector.load %arg11[%c0_26, %c0_27] : memref<128x8xbf16, #tpu.memory_space<vmem>>, vector<128x8xbf16>
      tpu.vector_store %arg11[%c0_26, %c0_27], %29 {strides = array<i32>} : memref<128x8xbf16, #tpu.memory_space<vmem>>, vector<128x8xbf16>,
      %c0_28 = arith.constant 0 : index
      %c0_29 = arith.constant 0 : index
      %31 = vector.load %arg9[%c0_28, %c0_29] : memref<16x8xf32, #tpu.memory_space<vmem>>, vector<16x8xf32>
      %cst_30 = arith.constant dense<0.000000e+00> : vector<128x8xf32>
      %32 = tpu.matmul %26, %31, %cst_30 {dimension_numbers = #tpu.dot_dimension_numbers<[1], [0], [0], [1], [0, 0, 1, 1], [], []>} : vector<128x16xf32>, vector<16x8xf32>, vector<128x8xf32> -> vector<128x8xf32>
      %c0_31 = arith.constant 0 : index
      %c0_32 = arith.constant 0 : index
      %33 = vector.load %arg10[%c0_31, %c0_32] : memref<1x8xf32, #tpu.memory_space<vmem>>, vector<1x8xf32>
      %34 = vector.broadcast %33 : vector<1x8xf32> to vector<128x8xf32>
      %35 = arith.addf %32, %34 : vector<128x8xf32>
      %c0_33 = arith.constant 0 : index
      %c0_34 = arith.constant 0 : index
      %36 = vector.load %arg12[%c0_33, %c0_34] : memref<128x8xf32, #tpu.memory_space<vmem>>, vector<128x8xf32>
      tpu.vector_store %arg12[%c0_33, %c0_34], %35 {strides = array<i32>} : memref<128x8xf32, #tpu.memory_space<vmem>>, vector<128x8xf32>,
    } else {
    }
    return
  }
  func.func @transform_0(%arg0: i32, %arg1: i32) -> (i32, i32) {
    %c0_i32 = arith.constant 0 : i32
    return %arg0, %arg1 : i32, i32
  }
  func.func @transform_1(%arg0: i32, %arg1: i32) -> (i32, i32) {
    %c0_i32 = arith.constant 0 : i32
    %c0_i32_0 = arith.constant 0 : i32
    return %arg1, %c0_i32 : i32, i32
  }
  func.func @transform_2(%arg0: i32, %arg1: i32) -> (i32, i32) {
    %c0_i32 = arith.constant 0 : i32
    %c0_i32_0 = arith.constant 0 : i32
    return %arg0, %c0_i32 : i32, i32
  }
  func.func @transform_3(%arg0: i32, %arg1: i32) -> (i32, i32) {
    %c0_i32 = arith.constant 0 : i32
    %c0_i32_0 = arith.constant 0 : i32
    %c0_i32_1 = arith.constant 0 : i32
    return %c0_i32, %c0_i32_0 : i32, i32
  }
  func.func @transform_4(%arg0: i32, %arg1: i32) -> (i32, i32) {
    %c0_i32 = arith.constant 0 : i32
    %c0_i32_0 = arith.constant 0 : i32
    %c0_i32_1 = arith.constant 0 : i32
    return %c0_i32, %c0_i32_0 : i32, i32
  }
  func.func @transform_5(%arg0: i32, %arg1: i32) -> (i32, i32) {
    %c0_i32 = arith.constant 0 : i32
    %c0_i32_0 = arith.constant 0 : i32
    %c0_i32_1 = arith.constant 0 : i32
    return %c0_i32, %c0_i32_0 : i32, i32
  }
  func.func @transform_6(%arg0: i32, %arg1: i32) -> (i32, i32) {
    %c0_i32 = arith.constant 0 : i32
    %c0_i32_0 = arith.constant 0 : i32
    %c0_i32_1 = arith.constant 0 : i32
    return %c0_i32, %c0_i32_0 : i32, i32
  }
  func.func @transform_7(%arg0: i32, %arg1: i32) -> (i32, i32) {
    %c0_i32 = arith.constant 0 : i32
    %c0_i32_0 = arith.constant 0 : i32
    %c0_i32_1 = arith.constant 0 : i32
    return %c0_i32, %c0_i32_0 : i32, i32
  }
  func.func @transform_8(%arg0: i32, %arg1: i32) -> (i32, i32) {
    %c0_i32 = arith.constant 0 : i32
    %c0_i32_0 = arith.constant 0 : i32
    %c0_i32_1 = arith.constant 0 : i32
    return %c0_i32, %c0_i32_0 : i32, i32
  }
  func.func @transform_9(%arg0: i32, %arg1: i32) -> (i32, i32) {
    %c0_i32 = arith.constant 0 : i32
    %c0_i32_0 = arith.constant 0 : i32
    return %arg0, %c0_i32 : i32, i32
  }
  func.func @transform_10(%arg0: i32, %arg1: i32) -> (i32, i32) {
    %c0_i32 = arith.constant 0 : i32
    %c0_i32_0 = arith.constant 0 : i32
    return %arg0, %c0_i32 : i32, i32
  }
}

</mosaic_0001>

<bundles_post_ra>
// kernel: tpu_custom_call.1
= control target key start
LH: loop header
LB: loop body
LE: loop exit
PB: predicated region body
PF: predicated region fallthrough
CT: control target
= control target key end

     0   :  { %16 = vsyncpa [#allocation4], 0  ;;  %s3687_s0 = inlined_call_operand.hbm [shape: bf16[512,512], index: 0, kind: input, shape index: {}]   ;;  %s3688_s1 = inlined_call_operand.vmem [shape: bf16[512,8], index: 1, kind: input, shape index: {}]   ;;  %s3689_s2 = inlined_call_operand.vmem [shape: f32[512,8], index: 2, kind: input, shape index: {}]   ;;  %s3690_s3 = inlined_call_operand.vmem [shape: f32[8,16], index: 3, kind: input, shape index: {}]   ;;  %s3691_s4 = inlined_call_operand.vmem [shape: f32[8,16], index: 4, kind: input, shape index: {}]   ;;  %s3692_s5 = inlined_call_operand.vmem [shape: f32[1,16], index: 5, kind: input, shape index: {}]   ;;  %s3693_s6 = inlined_call_operand.vmem [shape: f32[16,8], index: 6, kind: input, shape index: {}]   ;;  %s3694_s7 = inlined_call_operand.vmem [shape: f32[16,8], index: 7, kind: input, shape index: {}]   ;;  %s3695_s8 = inlined_call_operand.vmem [shape: f32[1,8], index: 8, kind: input, shape index: {}]   ;;  %s3696_s9 = inlined_call_operand.vmem [shape: bf16[512,8], index: 9, kind: output, shape index: {0}]   ;;  %s3697_s10 = inlined_call_operand.vmem [shape: f32[512,8], index: 10, kind: output, shape index: {1}]  }
   0x1   :  { %18 = vsyncpa [#allocation4 + $0x1], 0  ;;  %s3172_s13 = smov 0   ;;  %s3174_s14 = smov 0  }
   0x2   :  { %s3176_s15 = smov 0   ;;  %s3178_s16 = smov 0  }
   0x3   :  { %s3180_s17 = smov 0   ;;  %s3182_s18 = smov 0  }
   0x4 LB: > { %s2300_s19 = sadd.s32 4294967295, %s3111_s18   ;;  %s36_s20 = sadd.s32 1, %s3107_s17  ;;  %s3111_s18 = sphi %s3182_s18, %s24_s18   ;;  %s3107_s17 = sphi %s3180_s17, %s3705_s17   ;;  %s3103_s16 = sphi %s3178_s16, %s3704_s16   ;;  %s3099_s15 = sphi %s3176_s15, %s3703_s15   ;;  %s3095_s14 = sphi %s3174_s14, %s3702_s14   ;;  %s3091_s13 = sphi %s3172_s13, %s3701_s13  }
   0x5   : > { %p38_p0 = scmp.ge.s32.totalorder %s36_s20, 4  ;;  %s45_s21 = sadd.s32 1, %s3099_s15 }
   0x6   : > { %p52_p1 = scmp.ne.s32.totalorder %s3099_s15, %s3095_s14  ;;  %p53_p2 = scmp.eq.s32.totalorder %s3111_s18, 0 }
   0x7   : > { %s3707_s20 = smov (%p38_p0, %s36_s20), 0  ;;  %p58_p4 = scmp.ne.s32.totalorder %s3095_s14, %s3091_s13 }
   0x8   : > { %p3208_p3 = por %p53_p2, %p52_p1  ;;  %s40_s23 = ssub.s32 %s3107_s17, %s3707_s20 }
   0x9   : > { %p59_p5 = scmp.eq.s32.totalorder %s2300_s19, 0  ;;  %p43_p6 = scmp.eq.s32.totalorder %s40_s23, 0 }
   0xa   : > { %p2835_p8 = scmp.lt.s32.totalorder %s3111_s18, 4  ;;  %s339_s26 = sand.u32 1, %s3099_s15  }
   0xb   : > { %p3215_p7 = por %p59_p5, %p58_p4  ;;  %s2482_s27 = sshll.u32 %s3107_s17, 12 }
   0xc   : > { %s3221_s25 = scalar_select %p43_p6, %s3099_s15, %s45_s21  }
   0xd   : > { %s2305_s28 = sshll.u32 %s339_s26, 8  ;;  %s3228_s11 = scalar_lea.hbm %s3687_s0, %s2482_s27 }
   0xe   : > { %s343_s12 = scalar_lea.vmem [#allocation3], %s2305_s28  ;;  %p3232_p9 = pnand %p2835_p8, %p3208_p3 }
   0xf   : > { %s353_s13 = sshll.u32 %s343_s12, 4  ;;  %s3238_s21 = scalar_lea.sflag [#allocation4], %s339_s26  ;;  %s3236_s13 = int_to_ptr.vmem [resolvable:$true] %s353_s13 }
  0x10   : > { %s3031_s23 = scalar_lea.hbm %s3228_s11, 4096  ;;  %p3033_p11 = pneg %p3232_p9 }
  0x11   : > { %p3032_p10 = scmp.ne.s32.totalorder %s3228_s11, %s3031_s23  ;;  %s3036_s28 = scalar_lea.hbm %s3687_s0, 16384 }
  0x12   : > { %p3037_p0 = scmp.lt.u32.totalorder %s3228_s11, %s3687_s0  ;;  %p3038_p1 = scmp.lt.u32.totalorder %s3036_s28, %s3031_s23 }
  0x13   : > { %p3034_p12 = pnand %p3033_p11, %p3032_p10  ;;  %p3040_p3 = scmp.lt.u32.totalorder %s3031_s23, %s3228_s11 }
  0x14   : > { %p3039_p2 = por %p3038_p1, %p3037_p0 }
  0x15   : > { %p3035_p13 = pneg %p3034_p12 }
  0x16   : > { %p3041_p4 = por %p3040_p3, %p3039_p2 }
  0x18   : > { %p3042_p5 = pnand %p3041_p4, %p3035_p13 }
  0x1a   : > { %3045 = shalt.err (!%p3042_p5)
}
  0x1b   : > { %s3046_s26 = scalar_lea.vmem %s3236_s13, 4096  ;;  %s3113_s12 = smov [#allocation3]  }
  0x1c   : > { %p3047_p6 = scmp.ne.s32.totalorder %s3236_s13, %s3046_s26  ;;  %s3051_s27 = sshll.u32 %s3113_s12, 4  ;;  %s3052_s27 = int_to_ptr.vmem [resolvable:$false] %s3051_s27 }
  0x1d   : > { %s3053_s22 = scalar_lea.vmem %s3052_s27, 8192  ;;  %p3054_p12 = scmp.lt.s32.totalorder %s3236_s13, %s3052_s27 }
  0x1e   : > { %p3049_p8 = pnand %p3047_p6, %p3033_p11  ;;  %p3055_p0 = scmp.lt.s32.totalorder %s3053_s22, %s3046_s26 }
  0x20   : > { %p3050_p10 = pneg %p3049_p8  ;;  %p3056_p1 = por %p3055_p0, %p3054_p12 }
  0x22   : > { %p3057_p2 = pnand %p3056_p1, %p3050_p10 }
  0x24   : > { %3060 = shalt.err (!%p3057_p2)
}
  0x25   : > { %s3114_s23 = smov 256   ;;  %s3115_s28 = smov 16  }
  0x26   : > { %2834 = dma.hbm_to_vmem [thread:$0]  (!%p3232_p9), %s3228_s11, 4096, %s3236_s13, %s3238_s21, %s3114_s23, %s3114_s23, %s3115_s28  }
  0x27   : > { %p2309_p11 = scmp.ge.s32.totalorder %s3111_s18, 1  ;;  %p370_p13 = scmp.lt.s32.totalorder %s3111_s18, 5 }
  0x29   : > { %p371_p3 = pnand %p2309_p11, %p370_p13 }
  0x2a   : > { %s376_s29 = sand.u32 (!%p371_p3), 1, %s3095_s14  }
  0x2b   : > { %374 = sbr.rel (%p371_p3) target bundleno = 861 (0x35d), region = 56  ;;  %s2310_s30 = sshll.u32 (!%p371_p3), %s376_s29, 8 }
  0x2c   : > { %s377_s26 = scalar_lea.sflag (!%p371_p3), [#allocation4], %s376_s29  ;;  %s3269_s12 = scalar_lea.vmem (!%p371_p3), [#allocation3], %s2310_s30 }
  0x32   : > { %3086 = dma.done.wait (%p3215_p7), %s377_s26, 4096  }
  0x33   : > { %3088 = vsyncadd (%p3215_p7), %s377_s26, 4294963200  ;;  %v2887_v0 = vld [vmem:[%s3688_s1 + $0x40] sm:$0xff]   ;;  %v2891_v4 = vld [vmem:[%s3688_s1 + $0x48] sm:$0xff]   ;;  %s2311_s23 = sshll.u32 %s3103_s16, 4  ;;  %vm463_vm0 = vcmask 64512   ;;  %vm1715_vm1 = vcmask 130048  }
  0x34   : > { %v2888_v1 = vld [vmem:[%s3688_s1 + $0xc0] sm:$0xff]   ;;  %2499 = vmatprep.subr.bf16.mxu0 %v2887_v0  ;;  %v2892_v5 = vld [vmem:[%s3688_s1 + $0xc8] sm:$0xff]   ;;  %v2895_v8 = vld [vmem:[%s3688_s1 + $0x50] sm:$0xff]   ;;  %p441_p7 = scmp.lt.s32.totalorder %s2311_s23, 63  ;;  %vm1973_vm2 = vcmask 60416  }
  0x35   : > { %v2889_v2 = vld [vmem:[%s3688_s1] sm:$0xff]   ;;  %2563 = vmatprep.subr.bf16.mxu1 %v2888_v1  ;;  %v2893_v6 = vld [vmem:[%s3688_s1 + $0x8] sm:$0xff]   ;;  %v2896_v9 = vld [vmem:[%s3688_s1 + $0xd0] sm:$0xff]  }
  0x36   : > { %v2890_v3 = vld [vmem:[%s3688_s1 + $0x80] sm:$0xff]   ;;  %2500 = vmatpush3.bf16.msra.mxu0 %v2889_v2  ;;  %v2894_v7 = vld [vmem:[%s3688_s1 + $0x88] sm:$0xff]   ;;  %v2897_v10 = vld [vmem:[%s3688_s1 + $0x10] sm:$0xff]   ;;  %s3709_s23 = smov (!%p441_p7, %s2311_s23), 63 }
  0x37   : > { %2564 = vmatpush3.bf16.msra.mxu1 %v2890_v3  ;;  %2501 = vmatprep.subr.bf16.mxu0 %v2891_v4  ;;  %v2898_v11 = vld [vmem:[%s3688_s1 + $0x90] sm:$0xff]   ;;  %v2899_v12 = vld [vmem:[%s3688_s1 + $0x58] sm:$0xff]   ;;  %v2903_v16 = vld [vmem:[%s3688_s1 + $0x60] sm:$0xff]   ;;  %s2312_s28 = sshll.u32 %s3709_s23, 3 }
  0x38   : > { %2565 = vmatprep.subr.bf16.mxu1 %v2892_v5  ;;  %v2900_v13 = vld [vmem:[%s3688_s1 + $0xd8] sm:$0xff]   ;;  %v2904_v17 = vld [vmem:[%s3688_s1 + $0xe0] sm:$0xff]   ;;  %v2907_v20 = vld [vmem:[%s3688_s1 + $0x68] sm:$0xff]   ;;  %s3413_s29 = scalar_lea.vmem %s3689_s2, %s2312_s28  ;;  %s3633_s21 = scalar_lea.vmem %s3697_s10, %s2312_s28 }
  0x39   : > { %v2901_v14 = vld [vmem:[%s3688_s1 + $0x18] sm:$0xff]   ;;  %v2905_v18 = vld [vmem:[%s3688_s1 + $0x20] sm:$0xff]   ;;  %v2908_v21 = vld [vmem:[%s3688_s1 + $0xe8] sm:$0xff]  }
  0x3a   : > { %2502 = vmatpush3.bf16.msra.mxu0 %v2893_v6  ;;  %v2902_v15 = vld [vmem:[%s3688_s1 + $0x98] sm:$0xff]   ;;  %v2906_v19 = vld [vmem:[%s3688_s1 + $0xa0] sm:$0xff]   ;;  %v2909_v22 = vld [vmem:[%s3688_s1 + $0x28] sm:$0xff]  }
  0x3b   : > { %2566 = vmatpush3.bf16.msra.mxu1 %v2894_v7  ;;  %2503 = vmatprep.subr.bf16.mxu0 %v2895_v8  ;;  %v2910_v23 = vld [vmem:[%s3688_s1 + $0xa8] sm:$0xff]   ;;  %v2911_v24 = vld [vmem:[%s3688_s1 + $0x70] sm:$0xff]   ;;  %v2915_v28 = vld [vmem:[%s3688_s1 + $0x78] sm:$0xff]  }
  0x3c   : > { %2567 = vmatprep.subr.bf16.mxu1 %v2896_v9  ;;  %v2912_v25 = vld [vmem:[%s3688_s1 + $0xf0] sm:$0xff]   ;;  %v2916_v29 = vld [vmem:[%s3688_s1 + $0xf8] sm:$0xff]   ;;  %v1207_v46 = vld [vmem:[%s3691_s4] sm:$0xff]  ;;  %v3116_v9 = vmov 0.0  }
  0x3d   : > { %v2913_v26 = vld [vmem:[%s3688_s1 + $0x30] sm:$0xff]   ;;  %v2917_v30 = vld [vmem:[%s3688_s1 + $0x38] sm:$0xff]   ;;  %v1191_v1 = vld [vmem:[%s3413_s29] sm:$0xff]  ;;  %464 = vst.msk [vmem:[#allocation2] sm:$0xff] %vm463_vm0, %v3116_v9 }
  0x3e   : > { %2504 = vmatpush3.bf16.msra.mxu0 %v2897_v10  ;;  %v2914_v27 = vld [vmem:[%s3688_s1 + $0xb0] sm:$0xff]   ;;  %v2918_v31 = vld [vmem:[%s3688_s1 + $0xb8] sm:$0xff]   ;;  %v1192_v2 = vld [vmem:[%s3413_s29 + $0x8] sm:$0xff]  ;;  %465 = vst.msk [vmem:[#allocation2 + $0x8] sm:$0xff] %vm463_vm0, %v3116_v9 }
  0x3f   : > { %2568 = vmatpush3.bf16.msra.mxu1 %v2898_v11  ;;  %2505 = vmatprep.subr.bf16.mxu0 %v2899_v12  ;;  %v2919_v32 = vld [vmem:[%s3269_s12] ss:$16 sps:$4 sm:$0xff]   ;;  %v2921_v33 = vld [vmem:[%s3269_s12 + $0x4] ss:$16 sps:$4 sm:$0xff]   ;;  %v2922_v34 = vld [vmem:[%s3269_s12 + $0x8] ss:$16 sps:$4 sm:$0xff]  }
  0x40   : > { %2569 = vmatprep.subr.bf16.mxu1 %v2900_v13  ;;  %v2924_v35 = vld [vmem:[%s3269_s12 + $0xc] ss:$16 sps:$4 sm:$0xff]   ;;  %976 = vmatprep.mubr.bf16.mxu0 %v2921_v33  ;;  %v2925_v36 = vld [vmem:[%s3269_s12 + $0x24] ss:$16 sps:$4 sm:$0xff]   ;;  %v2929_v38 = vld [vmem:[%s3269_s12 + $0x20] ss:$16 sps:$4 sm:$0xff]  }
  0x41   : > { %1073 = vmatprep.mubr.bf16.mxu1 %v2924_v35  ;;  %v2927_v37 = vld [vmem:[%s3269_s12 + $0x2c] ss:$16 sps:$4 sm:$0xff]   ;;  %v2930_v39 = vld [vmem:[%s3269_s12 + $0x28] ss:$16 sps:$4 sm:$0xff]   ;;  %v2931_v40 = vld [vmem:[%s3269_s12 + $0x44] ss:$16 sps:$4 sm:$0xff]  }
  0x42   : > { %2506 = vmatpush3.bf16.msra.mxu0 %v2901_v14  ;;  %v2933_v41 = vld [vmem:[%s3269_s12 + $0x4c] ss:$16 sps:$4 sm:$0xff]   ;;  %v2935_v42 = vld [vmem:[%s3269_s12 + $0x40] ss:$16 sps:$4 sm:$0xff]   ;;  %v2936_v43 = vld [vmem:[%s3269_s12 + $0x48] ss:$16 sps:$4 sm:$0xff]  }
  0x43   : > { %2570 = vmatpush3.bf16.msra.mxu1 %v2902_v15  ;;  %2507 = vmatprep.subr.bf16.mxu0 %v2903_v16  ;;  %v2937_v44 = vld [vmem:[%s3269_s12 + $0x64] ss:$16 sps:$4 sm:$0xff]   ;;  %v2939_v45 = vld [vmem:[%s3269_s12 + $0x6c] ss:$16 sps:$4 sm:$0xff]   ;;  %v2941_v47 = vld [vmem:[%s3269_s12 + $0x60] ss:$16 sps:$4 sm:$0xff]  }
  0x44   : > { %2571 = vmatprep.subr.bf16.mxu1 %v2904_v17  ;;  %v2942_v48 = vld [vmem:[%s3269_s12 + $0x68] ss:$16 sps:$4 sm:$0xff]   ;;  %v2943_v49 = vld [vmem:[%s3269_s12 + $0x84] ss:$16 sps:$4 sm:$0xff]   ;;  %v2945_v50 = vld [vmem:[%s3269_s12 + $0x8c] ss:$16 sps:$4 sm:$0xff]  }
  0x45   : > { %v2947_v51 = vld [vmem:[%s3269_s12 + $0x80] ss:$16 sps:$4 sm:$0xff]   ;;  %v2948_v52 = vld [vmem:[%s3269_s12 + $0x88] ss:$16 sps:$4 sm:$0xff]   ;;  %v2949_v53 = vld [vmem:[%s3269_s12 + $0xa4] ss:$16 sps:$4 sm:$0xff]  }
  0x46   : > { %2508 = vmatpush3.bf16.msra.mxu0 %v2905_v18  ;;  %v2951_v54 = vld [vmem:[%s3269_s12 + $0xac] ss:$16 sps:$4 sm:$0xff]   ;;  %v2953_v55 = vld [vmem:[%s3269_s12 + $0xa0] ss:$16 sps:$4 sm:$0xff]   ;;  %v2954_v56 = vld [vmem:[%s3269_s12 + $0xa8] ss:$16 sps:$4 sm:$0xff]  }
  0x47   : > { %2572 = vmatpush3.bf16.msra.mxu1 %v2906_v19  ;;  %2509 = vmatprep.subr.bf16.mxu0 %v2907_v20  ;;  %v2955_v57 = vld [vmem:[%s3269_s12 + $0xc4] ss:$16 sps:$4 sm:$0xff]   ;;  %v2957_v58 = vld [vmem:[%s3269_s12 + $0xcc] ss:$16 sps:$4 sm:$0xff]   ;;  %v2959_v59 = vld [vmem:[%s3269_s12 + $0xc0] ss:$16 sps:$4 sm:$0xff]  }
  0x48   : > { %2573 = vmatprep.subr.bf16.mxu1 %v2908_v21  ;;  %v2960_v60 = vld [vmem:[%s3269_s12 + $0xc8] ss:$16 sps:$4 sm:$0xff]   ;;  %v2961_v61 = vld [vmem:[%s3269_s12 + $0xe4] ss:$16 sps:$4 sm:$0xff]   ;;  %v2963_v62 = vld [vmem:[%s3269_s12 + $0xec] ss:$16 sps:$4 sm:$0xff]  }
  0x49   : > { %v2965_v63 = vld [vmem:[%s3269_s12 + $0xe0] ss:$16 sps:$4 sm:$0xff]   ;;  %v2966_v0 = vld [vmem:[%s3269_s12 + $0xe8] ss:$16 sps:$4 sm:$0xff]   ;;  %466 = vst.msk [vmem:[#allocation2 + $0x10] sm:$0xff] %vm463_vm0, %v3116_v9  ;;  %467 = vst.msk [vmem:[#allocation2 + $0x18] sm:$0xff] %vm463_vm0, %v3116_v9 }
  0x4a   : > { %2510 = vmatpush3.bf16.msra.mxu0 %v2909_v22  ;;  %v1193_v3 = vld [vmem:[%s3413_s29 + $0x10] sm:$0xff]  ;;  %v1194_v4 = vld [vmem:[%s3413_s29 + $0x18] sm:$0xff]  ;;  %v1195_v5 = vld [vmem:[%s3413_s29 + $0x20] sm:$0xff]  ;;  %468 = vst.msk [vmem:[#allocation2 + $0x20] sm:$0xff] %vm463_vm0, %v3116_v9  ;;  %s2314_s12 = sshll.u32 %s3709_s23, 2 }
  0x4b   : > { %2574 = vmatpush3.bf16.msra.mxu1 %v2910_v23  ;;  %2511 = vmatprep.subr.bf16.mxu0 %v2911_v24  ;;  %v1196_v6 = vld [vmem:[%s3413_s29 + $0x28] sm:$0xff]  ;;  %v1197_v7 = vld [vmem:[%s3413_s29 + $0x30] sm:$0xff]  ;;  %v1198_v8 = vld [vmem:[%s3413_s29 + $0x38] sm:$0xff]  ;;  %469 = vst.msk [vmem:[#allocation2 + $0x28] sm:$0xff] %vm463_vm0, %v3116_v9  ;;  %s3593_s27 = scalar_lea.vmem %s3696_s9, %s2314_s12 }
  0x4c   : > { %2575 = vmatprep.subr.bf16.mxu1 %v2912_v25  ;;  %470 = vst.msk [vmem:[#allocation2 + $0x30] sm:$0xff] %vm463_vm0, %v3116_v9  ;;  %471 = vst.msk [vmem:[#allocation2 + $0x38] sm:$0xff] %vm463_vm0, %v3116_v9  ;;  %v1199_v10 = vld [vmem:[%s3413_s29 + $0x40] sm:$0xff]  ;;  %v1200_v11 = vld [vmem:[%s3413_s29 + $0x48] sm:$0xff] }
  0x4d   : > { %472 = vst.msk [vmem:[#allocation2 + $0x40] sm:$0xff] %vm463_vm0, %v3116_v9  ;;  %473 = vst.msk [vmem:[#allocation2 + $0x48] sm:$0xff] %vm463_vm0, %v3116_v9  ;;  %v1201_v12 = vld [vmem:[%s3413_s29 + $0x50] sm:$0xff]  ;;  %v1202_v13 = vld [vmem:[%s3413_s29 + $0x58] sm:$0xff] }
  0x4e   : > { %2512 = vmatpush3.bf16.msra.mxu0 %v2913_v26  ;;  %474 = vst.msk [vmem:[#allocation2 + $0x50] sm:$0xff] %vm463_vm0, %v3116_v9  ;;  %475 = vst.msk [vmem:[#allocation2 + $0x58] sm:$0xff] %vm463_vm0, %v3116_v9  ;;  %v1203_v14 = vld [vmem:[%s3413_s29 + $0x60] sm:$0xff]  ;;  %v1204_v15 = vld [vmem:[%s3413_s29 + $0x68] sm:$0xff] }
  0x4f   : > { %2576 = vmatpush3.bf16.msra.mxu1 %v2914_v27  ;;  %2513 = vmatprep.subr.bf16.mxu0 %v2915_v28  ;;  %476 = vst.msk [vmem:[#allocation2 + $0x60] sm:$0xff] %vm463_vm0, %v3116_v9  ;;  %477 = vst.msk [vmem:[#allocation2 + $0x68] sm:$0xff] %vm463_vm0, %v3116_v9  ;;  %v1205_v16 = vld [vmem:[%s3413_s29 + $0x70] sm:$0xff]  ;;  %v1206_v17 = vld [vmem:[%s3413_s29 + $0x78] sm:$0xff] }
  0x50   : > { %2577 = vmatprep.subr.bf16.mxu1 %v2916_v29  ;;  %478 = vst.msk [vmem:[#allocation2 + $0x70] sm:$0xff] %vm463_vm0, %v3116_v9  ;;  %479 = vst.msk [vmem:[#allocation2 + $0x78] sm:$0xff] %vm463_vm0, %v3116_v9  ;;  %v1190_v18 = vld [vmem:[%s3690_s3] sm:$0xff]  ;;  %v1714_v20 = vld [vmem:[%s3693_s6 + $0x8] sm:$0xff] }
  0x51   : > { %v1713_v19 = vld [vmem:[%s3693_s6] sm:$0xff] }
  0x52   : > { %2514 = vmatpush3.bf16.msra.mxu0 %v2917_v30  ;;  %v2805_v21 = vpack.c.bf16 %v1714_v20, %v1713_v19 }
  0x53   : > { %2578 = vmatpush3.bf16.msra.mxu1 %v2918_v31  ;;  %2697 = vmatprep.subr.mxu0 %v1207_v46  ;;  %v480_v31 = vld [vmem:[#allocation2] sm:$0xff] }
  0x54   : > { %2806 = vmatprep.subr.bf16.mxu1 %v2805_v21 }
  0x55   : > { %977 = vmatmul.mubr.bf16.vlgmr.msra.gmra.mrb[0].mxu0 %v2919_v32 }
  0x56   : > { %1074 = vmatmul.mubr.bf16.vlgmr.msra.gmra.mrb[0].mxu1 %v2922_v34  ;;  %984 = vmatprep.mubr.bf16.mxu0 %v2925_v36  ;;  %v481_v36 = vld [vmem:[#allocation2 + $0x8] sm:$0xff] }
  0x57   : > { %1081 = vmatprep.mubr.bf16.mxu1 %v2927_v37  ;;  %2698 = vmatpush3.msra.mxu0 %v1207_v46 }
  0x58   : > { %2723 = vmatprep.subr.mxu0 %v1190_v18  ;;  %2808 = vmatpush3.bf16.msra.mxu1 %v2805_v21 }
  0x5d   : > { %985 = vmatmul.mubr.bf16.gmra.mrb[4].mxu0 %v2929_v38 }
  0x5e   : > { %1082 = vmatmul.mubr.bf16.gmra.mrb[4].mxu1 %v2930_v39  ;;  %992 = vmatprep.mubr.bf16.mxu0 %v2931_v40 }
  0x5f   : > { %1089 = vmatprep.mubr.bf16.mxu1 %v2933_v41 }
  0x65   : > { %993 = vmatmul.mubr.bf16.gmra.mrb[8].mxu0 %v2935_v42 }
  0x66   : > { %1090 = vmatmul.mubr.bf16.gmra.mrb[8].mxu1 %v2936_v43  ;;  %1000 = vmatprep.mubr.bf16.mxu0 %v2937_v44 }
  0x67   : > { %1097 = vmatprep.mubr.bf16.mxu1 %v2939_v45 }
  0x6d   : > { %1001 = vmatmul.mubr.bf16.gmra.mrb[12].mxu0 %v2941_v47 }
  0x6e   : > { %1098 = vmatmul.mubr.bf16.gmra.mrb[12].mxu1 %v2942_v48  ;;  %1008 = vmatprep.mubr.bf16.mxu0 %v2943_v49  ;;  %v482_v49 = vld [vmem:[#allocation2 + $0x10] sm:$0xff] }
  0x6f   : > { %1105 = vmatprep.mubr.bf16.mxu1 %v2945_v50 }
  0x75   : > { %1009 = vmatmul.mubr.bf16.gmra.mrb[16].mxu0 %v2947_v51 }
  0x76   : > { %1106 = vmatmul.mubr.bf16.gmra.mrb[16].mxu1 %v2948_v52  ;;  %1016 = vmatprep.mubr.bf16.mxu0 %v2949_v53 }
  0x77   : > { %1113 = vmatprep.mubr.bf16.mxu1 %v2951_v54  ;;  %v483_v54 = vld [vmem:[#allocation2 + $0x18] sm:$0xff] }
  0x7d   : > { %1017 = vmatmul.mubr.bf16.gmra.mrb[20].mxu0 %v2953_v55 }
  0x7e   : > { %1114 = vmatmul.mubr.bf16.gmra.mrb[20].mxu1 %v2954_v56  ;;  %1024 = vmatprep.mubr.bf16.mxu0 %v2955_v57 }
  0x7f   : > { %1121 = vmatprep.mubr.bf16.mxu1 %v2957_v58 }
  0x85   : > { %1025 = vmatmul.mubr.bf16.gmra.mrb[24].mxu0 %v2959_v59 }
  0x86   : > { %1122 = vmatmul.mubr.bf16.gmra.mrb[24].mxu1 %v2960_v60  ;;  %1032 = vmatprep.mubr.bf16.mxu0 %v2961_v61 }
  0x87   : > { %1129 = vmatprep.mubr.bf16.mxu1 %v2963_v62 }
  0x8d   : > { %1033 = vmatmul.mubr.bf16.gmra.mrb[28].mxu0 %v2965_v63 }
  0x8e   : > { %1130 = vmatmul.mubr.bf16.gmra.mrb[28].mxu1 %v2966_v0  ;;  %2699 = vmatprep.mubr.msk.f32.mxu0 %vm463_vm0, %v1191_v1 }
  0x95   : > { %2700 = vmatmul.mubr.msk.f32.vlgmr.msra.gmra.mrb[32].mxu0 %vm463_vm0, %v1192_v2 }
  0x96   : > { %2702 = vmatprep.mubr.msk.f32.mxu0 %vm463_vm0, %v1193_v3  ;;  %2724 = vmatpush3.msra.mxu0 %v1190_v18 }
  0x99   : > { %2703 = vmatmul.mubr.msk.f32.gmra.mrb[34].mxu0 %vm463_vm0, %v1194_v4 }
  0x9a   : > { %2705 = vmatprep.mubr.msk.f32.mxu0 %vm463_vm0, %v1195_v5  ;;  %v484_v5 = vld [vmem:[#allocation2 + $0x20] sm:$0xff] }
  0x9d   : > { %2706 = vmatmul.mubr.msk.f32.gmra.mrb[36].mxu0 %vm463_vm0, %v1196_v6 }
  0x9e   : > { %2708 = vmatprep.mubr.msk.f32.mxu0 %vm463_vm0, %v1197_v7 }
  0xa1   : > { %2709 = vmatmul.mubr.msk.f32.gmra.mrb[38].mxu0 %vm463_vm0, %v1198_v8 }
  0xa2   : > { %2711 = vmatprep.mubr.msk.f32.mxu0 %vm463_vm0, %v1199_v10  ;;  %v485_v10 = vld [vmem:[#allocation2 + $0x28] sm:$0xff] }
  0xa5   : > { %2712 = vmatmul.mubr.msk.f32.gmra.mrb[40].mxu0 %vm463_vm0, %v1200_v11 }
  0xa6   : > { %2714 = vmatprep.mubr.msk.f32.mxu0 %vm463_vm0, %v1201_v12 }
  0xa9   : > { %2715 = vmatmul.mubr.msk.f32.gmra.mrb[42].mxu0 %vm463_vm0, %v1202_v13 }
  0xaa   : > { %2717 = vmatprep.mubr.msk.f32.mxu0 %vm463_vm0, %v1203_v14 }
  0xad   : > { %2718 = vmatmul.mubr.msk.f32.gmra.mrb[44].mxu0 %vm463_vm0, %v1204_v15 }
  0xae   : > { %2720 = vmatprep.mubr.msk.f32.mxu0 %vm463_vm0, %v1205_v16 }
  0xb1   : > { %2721 = vmatmul.mubr.msk.f32.gmra.mrb[46].mxu0 %vm463_vm0, %v1206_v17 }
 0x128   : > { %v2515_v22 = vpop.f32.mrb[0].mxu0 }
 0x129   : > { %v2579_v23 = vpop.f32.mrb[0].mxu1  ;;  %v2516_v24 = vpop.f32.mrb[1].mxu0 }
 0x12a   : > { %v2517_v25 = vadd.f32 %v2516_v24, %v2515_v22  ;;  %v2580_v26 = vpop.f32.mrb[1].mxu1  ;;  %v2518_v27 = vpop.f32.mrb[2].mxu0 }
 0x12b   : > { %v2581_v28 = vadd.f32 %v2580_v26, %v2579_v23  ;;  %v2582_v29 = vpop.f32.mrb[2].mxu1  ;;  %v2519_v30 = vpop.f32.mrb[3].mxu0 }
 0x12c   : > { %v2520_v32 = vadd.f32 %v2519_v30, %v2518_v27  ;;  %v2583_v33 = vpop.f32.mrb[3].mxu1  ;;  %v487_v30 = vld [vmem:[#allocation2 + $0x38] sm:$0xff] }
 0x12d   : > { %v1076_v34 = vadd.f32 %v2581_v28, %v2517_v25  ;;  %v2584_v35 = vadd.f32 %v2583_v33, %v2582_v29  ;;  %v486_v25 = vld [vmem:[#allocation2 + $0x30] sm:$0xff] }
 0x12f   : > { %v1138_v37 = vadd.f32 %v1076_v34, %v480_v31  ;;  %v1079_v38 = vadd.f32 %v2584_v35, %v2520_v32 }
 0x130   : > { %v2521_v39 = vpop.f32.mrb[4].mxu0 }
 0x131   : > { %1155 = vst.msk [vmem:[#allocation2] sm:$0xff] %vm463_vm0, %v1138_v37  ;;  %v1139_v40 = vadd.f32 %v1079_v38, %v481_v36  ;;  %v2585_v41 = vpop.f32.mrb[4].mxu1  ;;  %v2522_v42 = vpop.f32.mrb[5].mxu0 }
 0x132   : > { %v2523_v43 = vadd.f32 %v2522_v42, %v2521_v39  ;;  %v2586_v44 = vpop.f32.mrb[5].mxu1  ;;  %v2524_v45 = vpop.f32.mrb[6].mxu0 }
 0x133   : > { %1156 = vst.msk [vmem:[#allocation2 + $0x8] sm:$0xff] %vm463_vm0, %v1139_v40  ;;  %v2587_v46 = vadd.f32 %v2586_v44, %v2585_v41  ;;  %v2588_v47 = vpop.f32.mrb[6].mxu1  ;;  %v2525_v48 = vpop.f32.mrb[7].mxu0 }
 0x134   : > { %v2526_v50 = vadd.f32 %v2525_v48, %v2524_v45  ;;  %v2589_v51 = vpop.f32.mrb[7].mxu1  ;;  %v488_v45 = vld [vmem:[#allocation2 + $0x40] sm:$0xff] }
 0x135   : > { %v1084_v52 = vadd.f32 %v2587_v46, %v2523_v43  ;;  %v2590_v53 = vadd.f32 %v2589_v51, %v2588_v47 }
 0x137   : > { %v1140_v55 = vadd.f32 %v1084_v52, %v482_v49  ;;  %v1087_v56 = vadd.f32 %v2590_v53, %v2526_v50  ;;  %v489_v50 = vld [vmem:[#allocation2 + $0x48] sm:$0xff] }
 0x138   : > { %v2527_v57 = vpop.f32.mrb[8].mxu0  ;;  %v1174_v58 = vld [vmem:[#allocation2] sm:$0xff] }
 0x139   : > { %1157 = vst.msk [vmem:[#allocation2 + $0x10] sm:$0xff] %vm463_vm0, %v1140_v55  ;;  %v1141_v59 = vadd.f32 %v1087_v56, %v483_v54  ;;  %v2591_v60 = vpop.f32.mrb[8].mxu1  ;;  %2725 = vmatprep.mubr.msk.f32.mxu0 %vm463_vm0, %v1174_v58  ;;  %v2528_v61 = vpop.f32.mrb[9].mxu0 }
 0x13a   : > { %v2529_v62 = vadd.f32 %v2528_v61, %v2527_v57  ;;  %v2592_v63 = vpop.f32.mrb[9].mxu1  ;;  %v2530_v0 = vpop.f32.mrb[10].mxu0  ;;  %v1175_v1 = vld [vmem:[#allocation2 + $0x8] sm:$0xff] }
 0x13b   : > { %1158 = vst.msk [vmem:[#allocation2 + $0x18] sm:$0xff] %vm463_vm0, %v1141_v59  ;;  %v2593_v2 = vadd.f32 %v2592_v63, %v2591_v60  ;;  %v2594_v3 = vpop.f32.mrb[10].mxu1  ;;  %2726 = vmatmul.mubr.msk.f32.vlgmr.msra.gmra.mrb[32].mxu0 %vm463_vm0, %v1175_v1  ;;  %v2531_v4 = vpop.f32.mrb[11].mxu0  ;;  %v490_v1 = vld [vmem:[#allocation2 + $0x50] sm:$0xff] }
 0x13c   : > { %v2532_v6 = vadd.f32 %v2531_v4, %v2530_v0  ;;  %v2595_v7 = vpop.f32.mrb[11].mxu1 }
 0x13d   : > { %v1092_v8 = vadd.f32 %v2593_v2, %v2529_v62  ;;  %v2596_v9 = vadd.f32 %v2595_v7, %v2594_v3 }
 0x13f   : > { %v1142_v11 = vadd.f32 %v1092_v8, %v484_v5  ;;  %v1095_v12 = vadd.f32 %v2596_v9, %v2532_v6  ;;  %v491_v6 = vld [vmem:[#allocation2 + $0x58] sm:$0xff] }
 0x140   : > { %v2533_v13 = vpop.f32.mrb[12].mxu0  ;;  %v1176_v14 = vld [vmem:[#allocation2 + $0x10] sm:$0xff] }
 0x141   : > { %1159 = vst.msk [vmem:[#allocation2 + $0x20] sm:$0xff] %vm463_vm0, %v1142_v11  ;;  %v1143_v15 = vadd.f32 %v1095_v12, %v485_v10  ;;  %v2597_v16 = vpop.f32.mrb[12].mxu1  ;;  %2728 = vmatprep.mubr.msk.f32.mxu0 %vm463_vm0, %v1176_v14  ;;  %v2534_v17 = vpop.f32.mrb[13].mxu0 }
 0x142   : > { %v2535_v18 = vadd.f32 %v2534_v17, %v2533_v13  ;;  %v2598_v19 = vpop.f32.mrb[13].mxu1  ;;  %v2536_v20 = vpop.f32.mrb[14].mxu0  ;;  %v1177_v21 = vld [vmem:[#allocation2 + $0x18] sm:$0xff] }
 0x143   : > { %1160 = vst.msk [vmem:[#allocation2 + $0x28] sm:$0xff] %vm463_vm0, %v1143_v15  ;;  %v2599_v22 = vadd.f32 %v2598_v19, %v2597_v16  ;;  %v2600_v23 = vpop.f32.mrb[14].mxu1  ;;  %2729 = vmatmul.mubr.msk.f32.gmra.mrb[34].mxu0 %vm463_vm0, %v1177_v21  ;;  %v2537_v24 = vpop.f32.mrb[15].mxu0  ;;  %v492_v21 = vld [vmem:[#allocation2 + $0x60] sm:$0xff] }
 0x144   : > { %v2538_v26 = vadd.f32 %v2537_v24, %v2536_v20  ;;  %v2601_v27 = vpop.f32.mrb[15].mxu1 }
 0x145   : > { %v1100_v28 = vadd.f32 %v2599_v22, %v2535_v18  ;;  %v2602_v29 = vadd.f32 %v2601_v27, %v2600_v23 }
 0x147   : > { %v1144_v31 = vadd.f32 %v1100_v28, %v486_v25  ;;  %v1103_v32 = vadd.f32 %v2602_v29, %v2538_v26  ;;  %v493_v26 = vld [vmem:[#allocation2 + $0x68] sm:$0xff] }
 0x148   : > { %v2539_v33 = vpop.f32.mrb[16].mxu0  ;;  %v1178_v34 = vld [vmem:[#allocation2 + $0x20] sm:$0xff] }
 0x149   : > { %1161 = vst.msk [vmem:[#allocation2 + $0x30] sm:$0xff] %vm463_vm0, %v1144_v31  ;;  %v1145_v35 = vadd.f32 %v1103_v32, %v487_v30  ;;  %v2603_v36 = vpop.f32.mrb[16].mxu1  ;;  %2731 = vmatprep.mubr.msk.f32.mxu0 %vm463_vm0, %v1178_v34  ;;  %v2540_v37 = vpop.f32.mrb[17].mxu0 }
 0x14a   : > { %v2541_v38 = vadd.f32 %v2540_v37, %v2539_v33  ;;  %v2604_v39 = vpop.f32.mrb[17].mxu1  ;;  %v2542_v40 = vpop.f32.mrb[18].mxu0  ;;  %v1179_v41 = vld [vmem:[#allocation2 + $0x28] sm:$0xff] }
 0x14b   : > { %1162 = vst.msk [vmem:[#allocation2 + $0x38] sm:$0xff] %vm463_vm0, %v1145_v35  ;;  %v2605_v42 = vadd.f32 %v2604_v39, %v2603_v36  ;;  %v2606_v43 = vpop.f32.mrb[18].mxu1  ;;  %2732 = vmatmul.mubr.msk.f32.gmra.mrb[36].mxu0 %vm463_vm0, %v1179_v41  ;;  %v2543_v44 = vpop.f32.mrb[19].mxu0  ;;  %v494_v41 = vld [vmem:[#allocation2 + $0x70] sm:$0xff] }
 0x14c   : > { %v2544_v46 = vadd.f32 %v2543_v44, %v2542_v40  ;;  %v2607_v47 = vpop.f32.mrb[19].mxu1 }
 0x14d   : > { %v1108_v48 = vadd.f32 %v2605_v42, %v2541_v38  ;;  %v2608_v49 = vadd.f32 %v2607_v47, %v2606_v43 }
 0x14f   : > { %v1146_v51 = vadd.f32 %v1108_v48, %v488_v45  ;;  %v1111_v52 = vadd.f32 %v2608_v49, %v2544_v46  ;;  %v495_v46 = vld [vmem:[#allocation2 + $0x78] sm:$0xff] }
 0x150   : > { %v2545_v53 = vpop.f32.mrb[20].mxu0  ;;  %v1180_v54 = vld [vmem:[#allocation2 + $0x30] sm:$0xff] }
 0x151   : > { %1163 = vst.msk [vmem:[#allocation2 + $0x40] sm:$0xff] %vm463_vm0, %v1146_v51  ;;  %v1147_v55 = vadd.f32 %v1111_v52, %v489_v50  ;;  %v2609_v56 = vpop.f32.mrb[20].mxu1  ;;  %2734 = vmatprep.mubr.msk.f32.mxu0 %vm463_vm0, %v1180_v54  ;;  %v2546_v57 = vpop.f32.mrb[21].mxu0  ;;  %v1990_v54 = vld [vmem:[%s3694_s7] sm:$0xff] }
 0x152   : > { %v2547_v58 = vadd.f32 %v2546_v57, %v2545_v53  ;;  %v2610_v59 = vpop.f32.mrb[21].mxu1  ;;  %v2548_v60 = vpop.f32.mrb[22].mxu0  ;;  %v1181_v61 = vld [vmem:[#allocation2 + $0x38] sm:$0xff]  ;;  %v3515_v57 = vld [vmem:[%s3692_s5] ss:$0 sm:$0xff] }
 0x153   : > { %1164 = vst.msk [vmem:[#allocation2 + $0x48] sm:$0xff] %vm463_vm0, %v1147_v55  ;;  %v2611_v62 = vadd.f32 %v2610_v59, %v2609_v56  ;;  %v2612_v63 = vpop.f32.mrb[22].mxu1  ;;  %2735 = vmatmul.mubr.msk.f32.gmra.mrb[38].mxu0 %vm463_vm0, %v1181_v61  ;;  %v2549_v0 = vpop.f32.mrb[23].mxu0  ;;  %v1991_v55 = vld [vmem:[%s3694_s7 + $0x8] sm:$0xff] }
 0x154   : > { %v2550_v2 = vadd.f32 %v2549_v0, %v2548_v60  ;;  %v2613_v3 = vpop.f32.mrb[23].mxu1  ;;  %v2809_v56 = vpack.c.bf16 %v1991_v55, %v1990_v54 }
 0x155   : > { %v1116_v4 = vadd.f32 %v2611_v62, %v2547_v58  ;;  %v2614_v5 = vadd.f32 %v2613_v3, %v2612_v63 }
 0x156   : > { %2810 = vmatprep.subr.bf16.mxu1 %v2809_v56 }
 0x157   : > { %v1148_v7 = vadd.f32 %v1116_v4, %v490_v1  ;;  %v1119_v8 = vadd.f32 %v2614_v5, %v2550_v2 }
 0x158   : > { %v2551_v9 = vpop.f32.mrb[24].mxu0  ;;  %v1182_v10 = vld [vmem:[#allocation2 + $0x40] sm:$0xff] }
 0x159   : > { %1165 = vst.msk [vmem:[#allocation2 + $0x50] sm:$0xff] %vm463_vm0, %v1148_v7  ;;  %v1149_v11 = vadd.f32 %v1119_v8, %v491_v6  ;;  %v2615_v12 = vpop.f32.mrb[24].mxu1  ;;  %2737 = vmatprep.mubr.msk.f32.mxu0 %vm463_vm0, %v1182_v10  ;;  %v2552_v13 = vpop.f32.mrb[25].mxu0 }
 0x15a   : > { %v2553_v14 = vadd.f32 %v2552_v13, %v2551_v9  ;;  %v2616_v15 = vpop.f32.mrb[25].mxu1  ;;  %v2554_v16 = vpop.f32.mrb[26].mxu0  ;;  %v1183_v17 = vld [vmem:[#allocation2 + $0x48] sm:$0xff] }
 0x15b   : > { %1166 = vst.msk [vmem:[#allocation2 + $0x58] sm:$0xff] %vm463_vm0, %v1149_v11  ;;  %v2617_v18 = vadd.f32 %v2616_v15, %v2615_v12  ;;  %v2618_v19 = vpop.f32.mrb[26].mxu1  ;;  %2738 = vmatmul.mubr.msk.f32.gmra.mrb[40].mxu0 %vm463_vm0, %v1183_v17  ;;  %v2555_v20 = vpop.f32.mrb[27].mxu0 }
 0x15c   : > { %v2556_v22 = vadd.f32 %v2555_v20, %v2554_v16  ;;  %v2619_v23 = vpop.f32.mrb[27].mxu1 }
 0x15d   : > { %v1124_v24 = vadd.f32 %v2617_v18, %v2553_v14  ;;  %v2620_v25 = vadd.f32 %v2619_v23, %v2618_v19 }
 0x15f   : > { %v1150_v27 = vadd.f32 %v1124_v24, %v492_v21  ;;  %v1127_v28 = vadd.f32 %v2620_v25, %v2556_v22 }
 0x160   : > { %v2557_v29 = vpop.f32.mrb[28].mxu0  ;;  %v1184_v30 = vld [vmem:[#allocation2 + $0x50] sm:$0xff] }
 0x161   : > { %1167 = vst.msk [vmem:[#allocation2 + $0x60] sm:$0xff] %vm463_vm0, %v1150_v27  ;;  %v1151_v31 = vadd.f32 %v1127_v28, %v493_v26  ;;  %v2621_v32 = vpop.f32.mrb[28].mxu1  ;;  %2740 = vmatprep.mubr.msk.f32.mxu0 %vm463_vm0, %v1184_v30  ;;  %v2558_v33 = vpop.f32.mrb[29].mxu0 }
 0x162   : > { %v2559_v34 = vadd.f32 %v2558_v33, %v2557_v29  ;;  %v2622_v35 = vpop.f32.mrb[29].mxu1  ;;  %v2560_v36 = vpop.f32.mrb[30].mxu0  ;;  %v1185_v37 = vld [vmem:[#allocation2 + $0x58] sm:$0xff] }
 0x163   : > { %1168 = vst.msk [vmem:[#allocation2 + $0x68] sm:$0xff] %vm463_vm0, %v1151_v31  ;;  %v2623_v38 = vadd.f32 %v2622_v35, %v2621_v32  ;;  %v2624_v39 = vpop.f32.mrb[30].mxu1  ;;  %2741 = vmatmul.mubr.msk.f32.gmra.mrb[42].mxu0 %vm463_vm0, %v1185_v37  ;;  %v2561_v40 = vpop.f32.mrb[31].mxu0 }
 0x164   : > { %v2562_v42 = vadd.f32 %v2561_v40, %v2560_v36  ;;  %v2625_v43 = vpop.f32.mrb[31].mxu1 }
 0x165   : > { %v1132_v44 = vadd.f32 %v2623_v38, %v2559_v34  ;;  %v2626_v45 = vadd.f32 %v2625_v43, %v2624_v39 }
 0x167   : > { %v1152_v47 = vadd.f32 %v1132_v44, %v494_v41  ;;  %v1135_v48 = vadd.f32 %v2626_v45, %v2562_v42 }
 0x168   : > { %v1186_v49 = vld [vmem:[#allocation2 + $0x60] sm:$0xff] }
 0x169   : > { %1169 = vst.msk [vmem:[#allocation2 + $0x70] sm:$0xff] %vm463_vm0, %v1152_v47  ;;  %v1153_v50 = vadd.f32 %v1135_v48, %v495_v46  ;;  %2743 = vmatprep.mubr.msk.f32.mxu0 %vm463_vm0, %v1186_v49 }
 0x16a   : > { %v1187_v51 = vld [vmem:[#allocation2 + $0x68] sm:$0xff] }
 0x16b   : > { %1170 = vst.msk [vmem:[#allocation2 + $0x78] sm:$0xff] %vm463_vm0, %v1153_v50  ;;  %2744 = vmatmul.mubr.msk.f32.gmra.mrb[44].mxu0 %vm463_vm0, %v1187_v51 }
 0x170   : > { %v1188_v52 = vld [vmem:[#allocation2 + $0x70] sm:$0xff] }
 0x171   : > { %2746 = vmatprep.mubr.msk.f32.mxu0 %vm463_vm0, %v1188_v52 }
 0x172   : > { %v1189_v53 = vld [vmem:[#allocation2 + $0x78] sm:$0xff] }
 0x173   : > { %2747 = vmatmul.mubr.msk.f32.gmra.mrb[46].mxu0 %vm463_vm0, %v1189_v53 }
 0x20e   : > { %v2727_v58 = vpop.f32.mrb[32].mxu0 }
 0x20f   : > { %v1602_v59 = vadd.f32 %v2727_v58, %v3515_v57  ;;  %v1515_v60 = vpop.f32.mrb[33].mxu0 }
 0x210   : > { %v1601_v61 = vadd.f32 %v3515_v57, %v1515_v60 }
 0x211   : > { %v2415_v62 = vmul.f32 -1.442695, %v1602_v59 }
 0x212   : > { %v2414_v63 = vmul.f32 -1.442695, %v1601_v61 }
 0x213   : > { %2967 = vpow2.f32 %v2415_v62 }
 0x214   : > { %2969 = vpow2.f32 %v2414_v63 }
 0x216   : > { %v2730_v0 = vpop.f32.mrb[34].mxu0 }
 0x217   : > { %v1604_v1 = vadd.f32 %v2730_v0, %v3515_v57  ;;  %v1525_v2 = vpop.f32.mrb[35].mxu0 }
 0x218   : > { %v1603_v3 = vadd.f32 %v3515_v57, %v1525_v2 }
 0x219   : > { %v2417_v4 = vmul.f32 -1.442695, %v1604_v1 }
 0x21a   : > { %v2416_v5 = vmul.f32 -1.442695, %v1603_v3 }
 0x21b   : > { %2971 = vpow2.f32 %v2417_v4 }
 0x21c   : > { %2973 = vpow2.f32 %v2416_v5 }
 0x21d   : > { %v2968_v6 = vpop.eup %2967 }
 0x21e   : > { %v2970_v7 = vpop.eup %2969  ;;  %v1666_v8 = vadd.f32 1.0, %v2968_v6  ;;  %v2733_v9 = vpop.f32.mrb[36].mxu0 }
 0x21f   : > { %v1665_v10 = vadd.f32 1.0, %v2970_v7  ;;  %v1606_v11 = vadd.f32 %v2733_v9, %v3515_v57  ;;  %v1535_v12 = vpop.f32.mrb[37].mxu0 }
 0x220   : > { %v1605_v13 = vadd.f32 %v3515_v57, %v1535_v12 }
 0x221   : > { %2975 = vrcp.f32 %v1665_v10  ;;  %v2419_v14 = vmul.f32 -1.442695, %v1606_v11 }
 0x222   : > { %2977 = vrcp.f32 %v1666_v8  ;;  %v2418_v15 = vmul.f32 -1.442695, %v1605_v13 }
 0x223   : > { %2979 = vpow2.f32 %v2419_v14 }
 0x224   : > { %2981 = vpow2.f32 %v2418_v15 }
 0x225   : > { %v2972_v16 = vpop.eup %2971 }
 0x226   : > { %v2974_v17 = vpop.eup %2973  ;;  %v1668_v18 = vadd.f32 1.0, %v2972_v16  ;;  %v2736_v19 = vpop.f32.mrb[38].mxu0 }
 0x227   : > { %v1667_v20 = vadd.f32 1.0, %v2974_v17  ;;  %v1608_v21 = vadd.f32 %v2736_v19, %v3515_v57  ;;  %v1545_v22 = vpop.f32.mrb[39].mxu0 }
 0x228   : > { %v1607_v23 = vadd.f32 %v3515_v57, %v1545_v22 }
 0x229   : > { %2983 = vrcp.f32 %v1667_v20  ;;  %v2421_v24 = vmul.f32 -1.442695, %v1608_v21 }
 0x22a   : > { %2985 = vrcp.f32 %v1668_v18  ;;  %v2420_v25 = vmul.f32 -1.442695, %v1607_v23 }
 0x22b   : > { %v3525_v26 = vpop.eup %2975  ;;  %2987 = vpow2.f32 %v2421_v24 }
 0x22c   : > { %v3527_v27 = vpop.eup %2977  ;;  %2989 = vpow2.f32 %v2420_v25  ;;  %2753 = vmatprep.mubr.msk.f32.mxu1 %vm1715_vm1, %v3525_v26 }
 0x22d   : > { %v2980_v28 = vpop.eup %2979  ;;  %2754 = vmatmul.mubr.msk.f32.vlgmr.msra.gmra.mrb[32].mxu1 %vm1715_vm1, %v3527_v27 }
 0x22e   : > { %v2982_v29 = vpop.eup %2981  ;;  %v1670_v30 = vadd.f32 1.0, %v2980_v28  ;;  %v2739_v31 = vpop.f32.mrb[40].mxu0  ;;  %2812 = vmatpush3.bf16.msra.mxu1 %v2809_v56 }
 0x22f   : > { %v1669_v32 = vadd.f32 1.0, %v2982_v29  ;;  %v1610_v33 = vadd.f32 %v2739_v31, %v3515_v57  ;;  %v1555_v34 = vpop.f32.mrb[41].mxu0 }
 0x230   : > { %v1609_v35 = vadd.f32 %v3515_v57, %v1555_v34 }
 0x231   : > { %2991 = vrcp.f32 %v1669_v32  ;;  %v2423_v36 = vmul.f32 -1.442695, %v1610_v33 }
 0x232   : > { %2993 = vrcp.f32 %v1670_v30  ;;  %v2422_v37 = vmul.f32 -1.442695, %v1609_v35 }
 0x233   : > { %v3535_v38 = vpop.eup %2983  ;;  %2995 = vpow2.f32 %v2423_v36 }
 0x234   : > { %v3537_v39 = vpop.eup %2985  ;;  %2997 = vpow2.f32 %v2422_v37  ;;  %2756 = vmatprep.mubr.msk.f32.mxu1 %vm1715_vm1, %v3535_v38 }
 0x235   : > { %v2988_v40 = vpop.eup %2987  ;;  %2757 = vmatmul.mubr.msk.f32.gmra.mrb[34].mxu1 %vm1715_vm1, %v3537_v39 }
 0x236   : > { %v2990_v41 = vpop.eup %2989  ;;  %v1672_v42 = vadd.f32 1.0, %v2988_v40  ;;  %v2742_v43 = vpop.f32.mrb[42].mxu0 }
 0x237   : > { %v1671_v44 = vadd.f32 1.0, %v2990_v41  ;;  %v1612_v45 = vadd.f32 %v2742_v43, %v3515_v57  ;;  %v1565_v46 = vpop.f32.mrb[43].mxu0 }
 0x238   : > { %v1611_v47 = vadd.f32 %v3515_v57, %v1565_v46 }
 0x239   : > { %2999 = vrcp.f32 %v1671_v44  ;;  %v2425_v48 = vmul.f32 -1.442695, %v1612_v45 }
 0x23a   : > { %3001 = vrcp.f32 %v1672_v42  ;;  %v2424_v49 = vmul.f32 -1.442695, %v1611_v47 }
 0x23b   : > { %v3545_v50 = vpop.eup %2991  ;;  %3003 = vpow2.f32 %v2425_v48 }
 0x23c   : > { %v3547_v51 = vpop.eup %2993  ;;  %3005 = vpow2.f32 %v2424_v49  ;;  %2759 = vmatprep.mubr.msk.f32.mxu1 %vm1715_vm1, %v3545_v50 }
 0x23d   : > { %v2996_v52 = vpop.eup %2995  ;;  %2760 = vmatmul.mubr.msk.f32.gmra.mrb[36].mxu1 %vm1715_vm1, %v3547_v51 }
 0x23e   : > { %v2998_v53 = vpop.eup %2997  ;;  %v1674_v54 = vadd.f32 1.0, %v2996_v52  ;;  %v2745_v55 = vpop.f32.mrb[44].mxu0 }
 0x23f   : > { %v1673_v56 = vadd.f32 1.0, %v2998_v53  ;;  %v1614_v58 = vadd.f32 %v2745_v55, %v3515_v57  ;;  %v1575_v59 = vpop.f32.mrb[45].mxu0 }
 0x240   : > { %v1613_v60 = vadd.f32 %v3515_v57, %v1575_v59  ;;  %v2462_v59 = vld [vmem:[%s3695_s8] ss:$0 sm:$0xff] }
 0x241   : > { %3007 = vrcp.f32 %v1673_v56  ;;  %v2427_v61 = vmul.f32 -1.442695, %v1614_v58 }
 0x242   : > { %3009 = vrcp.f32 %v1674_v54  ;;  %v2426_v62 = vmul.f32 -1.442695, %v1613_v60 }
 0x243   : > { %v3000_v63 = vpop.eup %2999  ;;  %3011 = vpow2.f32 %v2427_v61 }
 0x244   : > { %v3002_v0 = vpop.eup %3001  ;;  %3013 = vpow2.f32 %v2426_v62  ;;  %2762 = vmatprep.mubr.msk.f32.mxu1 %vm1715_vm1, %v3000_v63 }
 0x245   : > { %v3004_v1 = vpop.eup %3003  ;;  %2763 = vmatmul.mubr.msk.f32.gmra.mrb[38].mxu1 %vm1715_vm1, %v3002_v0 }
 0x246   : > { %v3006_v2 = vpop.eup %3005  ;;  %v1676_v3 = vadd.f32 1.0, %v3004_v1  ;;  %v2748_v4 = vpop.f32.mrb[46].mxu0 }
 0x247   : > { %v1675_v5 = vadd.f32 1.0, %v3006_v2  ;;  %v1616_v6 = vadd.f32 %v2748_v4, %v3515_v57  ;;  %v1585_v7 = vpop.f32.mrb[47].mxu0 }
 0x248   : > { %v1615_v8 = vadd.f32 %v3515_v57, %v1585_v7 }
 0x249   : > { %3015 = vrcp.f32 %v1675_v5  ;;  %v2429_v9 = vmul.f32 -1.442695, %v1616_v6 }
 0x24a   : > { %3017 = vrcp.f32 %v1676_v3  ;;  %v2428_v10 = vmul.f32 -1.442695, %v1615_v8 }
 0x24b   : > { %v3008_v11 = vpop.eup %3007  ;;  %3019 = vpow2.f32 %v2429_v9 }
 0x24c   : > { %v3010_v12 = vpop.eup %3009  ;;  %3021 = vpow2.f32 %v2428_v10  ;;  %2765 = vmatprep.mubr.msk.f32.mxu1 %vm1715_vm1, %v3008_v11 }
 0x24d   : > { %v3012_v13 = vpop.eup %3011  ;;  %2766 = vmatmul.mubr.msk.f32.gmra.mrb[40].mxu1 %vm1715_vm1, %v3010_v12 }
 0x24e   : > { %v3014_v14 = vpop.eup %3013  ;;  %v1678_v15 = vadd.f32 1.0, %v3012_v13 }
 0x24f   : > { %v1677_v16 = vadd.f32 1.0, %v3014_v14 }
 0x251   : > { %3023 = vrcp.f32 %v1677_v16 }
 0x252   : > { %3025 = vrcp.f32 %v1678_v15 }
 0x253   : > { %v3016_v17 = vpop.eup %3015 }
 0x254   : > { %v3018_v57 = vpop.eup %3017  ;;  %2768 = vmatprep.mubr.msk.f32.mxu1 %vm1715_vm1, %v3016_v17 }
 0x255   : > { %v3020_v18 = vpop.eup %3019  ;;  %2769 = vmatmul.mubr.msk.f32.gmra.mrb[42].mxu1 %vm1715_vm1, %v3018_v57 }
 0x256   : > { %v3022_v19 = vpop.eup %3021  ;;  %v1680_v20 = vadd.f32 1.0, %v3020_v18 }
 0x257   : > { %v1679_v21 = vadd.f32 1.0, %v3022_v19 }
 0x259   : > { %3027 = vrcp.f32 %v1679_v21 }
 0x25a   : > { %3029 = vrcp.f32 %v1680_v20 }
 0x25b   : > { %v3024_v22 = vpop.eup %3023 }
 0x25c   : > { %v3026_v23 = vpop.eup %3025  ;;  %2771 = vmatprep.mubr.msk.f32.mxu1 %vm1715_vm1, %v3024_v22 }
 0x25d   : > { %2772 = vmatmul.mubr.msk.f32.gmra.mrb[44].mxu1 %vm1715_vm1, %v3026_v23 }
 0x263   : > { %v3028_v24 = vpop.eup %3027 }
 0x264   : > { %v3030_v25 = vpop.eup %3029  ;;  %2774 = vmatprep.mubr.msk.f32.mxu1 %vm1715_vm1, %v3028_v24 }
 0x265   : > { %2775 = vmatmul.mubr.msk.f32.gmra.mrb[46].mxu1 %vm1715_vm1, %v3030_v25 }
 0x266   : > { %2781 = vmatprep.mubr.msk.f32.mxu1 %vm1715_vm1, %v3525_v26 }
 0x269   : > { %2782 = vmatmul.mubr.msk.f32.vlgmr.msra.gmra.mrb[48].mxu1 %vm1715_vm1, %v3527_v27 }
 0x26a   : > { %2784 = vmatprep.mubr.msk.f32.mxu1 %vm1715_vm1, %v3535_v38 }
 0x26d   : > { %2785 = vmatmul.mubr.msk.f32.gmra.mrb[50].mxu1 %vm1715_vm1, %v3537_v39 }
 0x26e   : > { %2787 = vmatprep.mubr.msk.f32.mxu1 %vm1715_vm1, %v3545_v50 }
 0x271   : > { %2788 = vmatmul.mubr.msk.f32.gmra.mrb[52].mxu1 %vm1715_vm1, %v3547_v51 }
 0x272   : > { %2790 = vmatprep.mubr.msk.f32.mxu1 %vm1715_vm1, %v3000_v63 }
 0x275   : > { %2791 = vmatmul.mubr.msk.f32.gmra.mrb[54].mxu1 %vm1715_vm1, %v3002_v0 }
 0x276   : > { %2793 = vmatprep.mubr.msk.f32.mxu1 %vm1715_vm1, %v3008_v11 }
 0x279   : > { %2794 = vmatmul.mubr.msk.f32.gmra.mrb[56].mxu1 %vm1715_vm1, %v3010_v12 }
 0x27a   : > { %2796 = vmatprep.mubr.msk.f32.mxu1 %vm1715_vm1, %v3016_v17 }
 0x27d   : > { %2797 = vmatmul.mubr.msk.f32.gmra.mrb[58].mxu1 %vm1715_vm1, %v3018_v57 }
 0x27e   : > { %2799 = vmatprep.mubr.msk.f32.mxu1 %vm1715_vm1, %v3024_v22 }
 0x281   : > { %2800 = vmatmul.mubr.msk.f32.gmra.mrb[60].mxu1 %vm1715_vm1, %v3026_v23 }
 0x282   : > { %2802 = vmatprep.mubr.msk.f32.mxu1 %vm1715_vm1, %v3028_v24 }
 0x285   : > { %2803 = vmatmul.mubr.msk.f32.gmra.mrb[62].mxu1 %vm1715_vm1, %v3030_v25 }
 0x300   : > { %v2755_v26 = vpop.f32.mrb[32].mxu1 }
 0x301   : > { %v2484_v27 = vpack.c.bf16 %v2755_v26, %v2755_v26  ;;  %v1830_v28 = vpop.f32.mrb[33].mxu1 }
 0x302   : > { %v2483_v29 = vpack.c.bf16 %v1830_v28, %v1830_v28 }
 0x303   : > { %1975 = vst.msk [vmem:[%s3593_s27 + $0x4] sm:$0xf] %vm1973_vm2, %v2484_v27 }
 0x304   : > { %1974 = vst.msk [vmem:[%s3593_s27] sm:$0xf] %vm1973_vm2, %v2483_v29 }
 0x308   : > { %v2758_v30 = vpop.f32.mrb[34].mxu1 }
 0x309   : > { %v2486_v31 = vpack.c.bf16 %v2758_v30, %v2758_v30  ;;  %v1840_v32 = vpop.f32.mrb[35].mxu1 }
 0x30a   : > { %v2485_v33 = vpack.c.bf16 %v1840_v32, %v1840_v32 }
 0x30b   : > { %1977 = vst.msk [vmem:[%s3593_s27 + $0xc] sm:$0xf] %vm1973_vm2, %v2486_v31 }
 0x30c   : > { %1976 = vst.msk [vmem:[%s3593_s27 + $0x8] sm:$0xf] %vm1973_vm2, %v2485_v33 }
 0x310   : > { %v2761_v34 = vpop.f32.mrb[36].mxu1 }
 0x311   : > { %v2488_v35 = vpack.c.bf16 %v2761_v34, %v2761_v34  ;;  %v1850_v36 = vpop.f32.mrb[37].mxu1 }
 0x312   : > { %v2487_v37 = vpack.c.bf16 %v1850_v36, %v1850_v36 }
 0x313   : > { %1979 = vst.msk [vmem:[%s3593_s27 + $0x14] sm:$0xf] %vm1973_vm2, %v2488_v35 }
 0x314   : > { %1978 = vst.msk [vmem:[%s3593_s27 + $0x10] sm:$0xf] %vm1973_vm2, %v2487_v37 }
 0x318   : > { %v2764_v38 = vpop.f32.mrb[38].mxu1 }
 0x319   : > { %v2490_v39 = vpack.c.bf16 %v2764_v38, %v2764_v38  ;;  %v1860_v40 = vpop.f32.mrb[39].mxu1 }
 0x31a   : > { %v2489_v41 = vpack.c.bf16 %v1860_v40, %v1860_v40 }
 0x31b   : > { %1981 = vst.msk [vmem:[%s3593_s27 + $0x1c] sm:$0xf] %vm1973_vm2, %v2490_v39 }
 0x31c   : > { %1980 = vst.msk [vmem:[%s3593_s27 + $0x18] sm:$0xf] %vm1973_vm2, %v2489_v41 }
 0x320   : > { %v2767_v42 = vpop.f32.mrb[40].mxu1 }
 0x321   : > { %v2492_v43 = vpack.c.bf16 %v2767_v42, %v2767_v42  ;;  %v1870_v44 = vpop.f32.mrb[41].mxu1 }
 0x322   : > { %v2491_v45 = vpack.c.bf16 %v1870_v44, %v1870_v44 }
 0x323   : > { %1983 = vst.msk [vmem:[%s3593_s27 + $0x24] sm:$0xf] %vm1973_vm2, %v2492_v43 }
 0x324   : > { %1982 = vst.msk [vmem:[%s3593_s27 + $0x20] sm:$0xf] %vm1973_vm2, %v2491_v45 }
 0x328   : > { %v2770_v46 = vpop.f32.mrb[42].mxu1 }
 0x329   : > { %v2494_v47 = vpack.c.bf16 %v2770_v46, %v2770_v46  ;;  %v1880_v48 = vpop.f32.mrb[43].mxu1 }
 0x32a   : > { %v2493_v49 = vpack.c.bf16 %v1880_v48, %v1880_v48 }
 0x32b   : > { %1985 = vst.msk [vmem:[%s3593_s27 + $0x2c] sm:$0xf] %vm1973_vm2, %v2494_v47 }
 0x32c   : > { %1984 = vst.msk [vmem:[%s3593_s27 + $0x28] sm:$0xf] %vm1973_vm2, %v2493_v49 }
 0x330   : > { %v2773_v50 = vpop.f32.mrb[44].mxu1 }
 0x331   : > { %v2496_v51 = vpack.c.bf16 %v2773_v50, %v2773_v50  ;;  %v1890_v52 = vpop.f32.mrb[45].mxu1 }
 0x332   : > { %v2495_v53 = vpack.c.bf16 %v1890_v52, %v1890_v52 }
 0x333   : > { %1987 = vst.msk [vmem:[%s3593_s27 + $0x34] sm:$0xf] %vm1973_vm2, %v2496_v51 }
 0x334   : > { %1986 = vst.msk [vmem:[%s3593_s27 + $0x30] sm:$0xf] %vm1973_vm2, %v2495_v53 }
 0x338   : > { %v2776_v54 = vpop.f32.mrb[46].mxu1 }
 0x339   : > { %v2498_v55 = vpack.c.bf16 %v2776_v54, %v2776_v54  ;;  %v1900_v56 = vpop.f32.mrb[47].mxu1 }
 0x33a   : > { %v2497_v58 = vpack.c.bf16 %v1900_v56, %v1900_v56 }
 0x33b   : > { %1989 = vst.msk [vmem:[%s3593_s27 + $0x3c] sm:$0xf] %vm1973_vm2, %v2498_v55 }
 0x33c   : > { %1988 = vst.msk [vmem:[%s3593_s27 + $0x38] sm:$0xf] %vm1973_vm2, %v2497_v58  ;;  %v2783_v60 = vpop.f32.mrb[48].mxu1 }
 0x33d   : > { %v2071_v61 = vadd.f32 %v2783_v60, %v2462_v59  ;;  %v2065_v62 = vpop.f32.mrb[49].mxu1 }
 0x33e   : > { %v2066_v63 = vadd.f32 %v2462_v59, %v2065_v62 }
 0x33f   : > { %2145 = vst.msk [vmem:[%s3633_s21 + $0x8] sm:$0xff] %vm463_vm0, %v2071_v61 }
 0x340   : > { %2144 = vst.msk [vmem:[%s3633_s21] sm:$0xff] %vm463_vm0, %v2066_v63  ;;  %v2786_v0 = vpop.f32.mrb[50].mxu1 }
 0x341   : > { %v2081_v1 = vadd.f32 %v2786_v0, %v2462_v59  ;;  %v2075_v2 = vpop.f32.mrb[51].mxu1 }
 0x342   : > { %v2076_v3 = vadd.f32 %v2462_v59, %v2075_v2 }
 0x343   : > { %2147 = vst.msk [vmem:[%s3633_s21 + $0x18] sm:$0xff] %vm463_vm0, %v2081_v1 }
 0x344   : > { %2146 = vst.msk [vmem:[%s3633_s21 + $0x10] sm:$0xff] %vm463_vm0, %v2076_v3  ;;  %v2789_v4 = vpop.f32.mrb[52].mxu1 }
 0x345   : > { %v2091_v5 = vadd.f32 %v2789_v4, %v2462_v59  ;;  %v2085_v6 = vpop.f32.mrb[53].mxu1 }
 0x346   : > { %v2086_v7 = vadd.f32 %v2462_v59, %v2085_v6 }
 0x347   : > { %2149 = vst.msk [vmem:[%s3633_s21 + $0x28] sm:$0xff] %vm463_vm0, %v2091_v5 }
 0x348   : > { %2148 = vst.msk [vmem:[%s3633_s21 + $0x20] sm:$0xff] %vm463_vm0, %v2086_v7  ;;  %v2792_v8 = vpop.f32.mrb[54].mxu1 }
 0x349   : > { %v2101_v9 = vadd.f32 %v2792_v8, %v2462_v59  ;;  %v2095_v10 = vpop.f32.mrb[55].mxu1 }
 0x34a   : > { %v2096_v11 = vadd.f32 %v2462_v59, %v2095_v10 }
 0x34b   : > { %2151 = vst.msk [vmem:[%s3633_s21 + $0x38] sm:$0xff] %vm463_vm0, %v2101_v9 }
 0x34c   : > { %2150 = vst.msk [vmem:[%s3633_s21 + $0x30] sm:$0xff] %vm463_vm0, %v2096_v11  ;;  %v2795_v12 = vpop.f32.mrb[56].mxu1 }
 0x34d   : > { %v2111_v13 = vadd.f32 %v2795_v12, %v2462_v59  ;;  %v2105_v14 = vpop.f32.mrb[57].mxu1 }
 0x34e   : > { %v2106_v15 = vadd.f32 %v2462_v59, %v2105_v14 }
 0x34f   : > { %2153 = vst.msk [vmem:[%s3633_s21 + $0x48] sm:$0xff] %vm463_vm0, %v2111_v13 }
 0x350   : > { %2152 = vst.msk [vmem:[%s3633_s21 + $0x40] sm:$0xff] %vm463_vm0, %v2106_v15  ;;  %v2798_v16 = vpop.f32.mrb[58].mxu1 }
 0x351   : > { %v2121_v17 = vadd.f32 %v2798_v16, %v2462_v59  ;;  %v2115_v57 = vpop.f32.mrb[59].mxu1 }
 0x352   : > { %v2116_v18 = vadd.f32 %v2462_v59, %v2115_v57 }
 0x353   : > { %2155 = vst.msk [vmem:[%s3633_s21 + $0x58] sm:$0xff] %vm463_vm0, %v2121_v17 }
 0x354   : > { %2154 = vst.msk [vmem:[%s3633_s21 + $0x50] sm:$0xff] %vm463_vm0, %v2116_v18  ;;  %v2801_v19 = vpop.f32.mrb[60].mxu1 }
 0x355   : > { %v2131_v20 = vadd.f32 %v2801_v19, %v2462_v59  ;;  %v2125_v21 = vpop.f32.mrb[61].mxu1 }
 0x356   : > { %v2126_v22 = vadd.f32 %v2462_v59, %v2125_v21 }
 0x357   : > { %2157 = vst.msk [vmem:[%s3633_s21 + $0x68] sm:$0xff] %vm463_vm0, %v2131_v20 }
 0x358   : > { %2156 = vst.msk [vmem:[%s3633_s21 + $0x60] sm:$0xff] %vm463_vm0, %v2126_v22  ;;  %v2804_v23 = vpop.f32.mrb[62].mxu1 }
 0x359   : > { %v2141_v24 = vadd.f32 %v2804_v23, %v2462_v59  ;;  %v2135_v25 = vpop.f32.mrb[63].mxu1 }
 0x35a   : > { %v2136_v26 = vadd.f32 %v2462_v59, %v2135_v25 }
 0x35b   : > { %2159 = vst.msk [vmem:[%s3633_s21 + $0x78] sm:$0xff] %vm463_vm0, %v2141_v24 }
 0x35c   : > { %2158 = vst.msk [vmem:[%s3633_s21 + $0x70] sm:$0xff] %vm463_vm0, %v2136_v26 }
 0x35d PF: > { %s24_s18 = sadd.s32 1, %s3111_s18   ;;  %s3701_s13 = smov %s3095_s14 }
 0x35e   : > { %p21_p9 = scmp.ge.s32.totalorder %s24_s18, 6   ;;  %s3702_s14 = smov %s3099_s15 }
 0x35f   : > { %s3703_s15 = smov %s3221_s25  ;;  %s3704_s16 = smov %s3107_s17 }
 0x360   : > { %s3705_s17 = smov %s3707_s20  ;;  %23 = sbr.rel (!%p21_p9) target bundleno = 4 (0x4), region = 122 }
 0x367   :  { %2199 = vsyncpa [#allocation4], 1 }
 0x368   :  { %2201 = vsyncpa [#allocation4 + $0x1], 1 }

</bundles_post_ra>
